<compile_context>
chip_gen: v6e
topology: v6e:2x2x1
jax: 0.10.0
libtpu: 0.0.40
codegen_flags: <defaults>
</compile_context>

<pallas_src>
import math
from functools import partial

import jax
import jax.numpy as jnp
from jax import lax
from jax.experimental import pallas as pl
from jax.experimental.pallas import tpu as pltpu  # noqa: F401  (kept for TPU-targeted builds)


# Param-slab row layout constants.
P_GLOBAL = 8     # lastnorm_g, lastnorm_b, head_wT, head_b, hm_0..hm_3
P_LAYER = 12     # norm0_g, norm0_b, bhv, bo, norm1_g, norm1_b, b0, b1, relhm_0..3


# --------------------------------------------------------------------------
# Fused Pallas kernel: tokenizer -> [GE-attention + FFN] x n_layers -> head
# --------------------------------------------------------------------------
def t2g_fused_kernel(x_ref, tok_ref, p_ref, w_ref, m_ref, o_ref, *,
                     B, NP, D, H, dh, d_hidden, layer_has_norm0):
    """Whole T2G-Former forward, fully resident in VMEM.

    x_ref  : (B*NP, D)   input column pre-broadcast to D lanes (CLS=1, pads=0)
    tok_ref: (2*B*NP, D) [tokenizer weight tiled ; tokenizer bias tiled]
    p_ref  : (P_GLOBAL + n_layers*P_LAYER, 128) all 1-row params (see layout)
    w_ref  : (n_layers*(3D+d_hidden), 128) [Whv; Wo; W0; W1] per layer, 0-padded
    m_ref  : (n_layers*H*B*NP, B*NP) per-(layer,head) masks: FR-Graph adjacency
             (-10000) + cross-batch / padding keys (-1e9)
    o_ref  : (B, 1)
    """
    NPB = B * NP
    HROWS = H * NPB
    WL = 3 * D + d_hidden           # weight-slab rows per layer

    def ln(v, g, b):
        mu = jnp.mean(v, axis=-1, keepdims=True)
        var = jnp.mean((v - mu) ** 2, axis=-1, keepdims=True)
        return (v - mu) * lax.rsqrt(var + 1e-5) * g + b

    # ---------------- Tokenizer: per-token scale & shift ----------------
    hf = x_ref[...] * tok_ref[0:NPB, :] + tok_ref[NPB:2 * NPB, :]   # (B*NP, D)

    for li, has_norm0 in enumerate(layer_has_norm0):
        pr = P_GLOBAL + li * P_LAYER
        wr = li * WL
        mr = li * HROWS

        # ------------- GE-attention block (pre-norm) -------------
        if has_norm0:
            xr = ln(hf, p_ref[pr:pr + 1, 0:D], p_ref[pr + 1:pr + 2, 0:D])
        else:                       # prenormalization=True: layer 0 has no norm0
            xr = hf

        # Fused [W_head | W_v] projection: one (B*NP, D)@(D, 2D) matmul.
        pv = jnp.dot(xr, w_ref[wr:wr + D, 0:2 * D],
                     preferred_element_type=jnp.float32) + p_ref[pr + 2:pr + 3, 0:2 * D]
        ft = pv[:, 0:D]             # shared head/tail projection (sym_weight)
        fv = pv[:, D:2 * D]

        # Head-stacked rel*scale-weighted queries: all heads & batches -> ONE matmul.
        fts_stack = jnp.concatenate(
            [ft * p_ref[pr + 8 + h:pr + 9 + h, 0:D] for h in range(H)], axis=0)  # (H*NPB, D)
        s = lax.dot_general(fts_stack, ft, (((1,), (1,)), ((), ())),
                            preferred_element_type=jnp.float32)                  # (H*NPB, NPB)

        # FR-Graph masked softmax; mask (added BEFORE row-max) also zeroes
        # cross-batch and padding keys exactly.
        logits = s + m_ref[mr:mr + HROWS, :]
        mmax = jnp.max(logits, axis=-1, keepdims=True)
        pexp = jnp.exp(logits - mmax)
        inv = pl.reciprocal(jnp.sum(pexp, axis=-1, keepdims=True), approx=True)
        probs = pexp * inv

        # PV for all heads in one matmul; per-head lane-select + sum reassembles
        # the head-concatenated output entirely in registers (no scratch stores).
        o_stack = jnp.dot(probs, fv, preferred_element_type=jnp.float32)          # (H*NPB, D)
        o = o_stack[0:NPB, :] * p_ref[4:5, 0:D]
        for h in range(1, H):
            o = o + o_stack[h * NPB:(h + 1) * NPB, :] * p_ref[4 + h:5 + h, 0:D]

        attn = jnp.dot(o, w_ref[wr + D:wr + 2 * D, 0:D],
                       preferred_element_type=jnp.float32) + p_ref[pr + 3:pr + 4, 0:D]
        # Last layer: reference keeps only CLS rows; here all rows are kept but
        # only CLS rows are ever read downstream, and those match exactly.
        hf = hf + attn

        # ------------- FFN block (pre-norm, reglu) -------------
        xn = ln(hf, p_ref[pr + 4:pr + 5, 0:D], p_ref[pr + 5:pr + 6, 0:D])
        z = jnp.dot(xn, w_ref[wr + 2 * D:wr + 3 * D, 0:2 * d_hidden],
                    preferred_element_type=jnp.float32) + p_ref[pr + 6:pr + 7, 0:2 * d_hidden]
        act = z[:, 0:d_hidden] * jnp.maximum(z[:, d_hidden:2 * d_hidden], 0.0)
        hf = hf + jnp.dot(act, w_ref[wr + 3 * D:wr + 3 * D + d_hidden, 0:D],
                          preferred_element_type=jnp.float32) + p_ref[pr + 7:pr + 8, 0:D]

    # ---------------- readout head (CLS rows gathered in registers) ----------------
    cls = jnp.concatenate([hf[b * NP:b * NP + 1, :] for b in range(B)], axis=0)    # (B, D)
    xn = jnp.maximum(ln(cls, p_ref[0:1, 0:D], p_ref[1:2, 0:D]), 0.0)   # relu (reglu head)
    out = jnp.sum(xn * p_ref[2:3, 0:D], axis=-1, keepdims=True) + p_ref[3:4, 0:1]
    o_ref[...] = out.astype(o_ref.dtype)


# --------------------------------------------------------------------------
# Static precompute (parameter-only, hoisted out of the forward)
# --------------------------------------------------------------------------
def compute_adj_mask(col_head, col_tail, top_bias, nh, n_cols):
    """Static FR-Graph topology -> additive mask (H, nh, n_cols). Parameter-only."""
    ch = col_head / jnp.maximum(
        jnp.linalg.norm(col_head, axis=-1, keepdims=True), 1e-12)
    ct = col_tail / jnp.maximum(
        jnp.linalg.norm(col_tail, axis=-1, keepdims=True), 1e-12)
    top = jnp.einsum('hnd,hmd->hnm', ch, ct)                     # (H, n_cols, n_cols)
    probs = jax.nn.sigmoid(top + top_bias)
    probs = probs * (1.0 - jnp.eye(n_cols, dtype=probs.dtype))   # no self interaction
    readout_mask = jnp.ones((n_cols,), probs.dtype).at[0].set(0.0)
    probs = probs * readout_mask                                 # prune edges to readout
    adj = (probs > 0.5).astype(jnp.float32)                      # ST-estimator forward value
    adj = adj[:, :nh]
    return (1.0 - adj) * -10000.0


def precompute_static(P, B):
    """Pack all parameters into a few row-padded slabs; build batched masks once."""
    cfg = P['cfg']
    D, H, dh, d_hidden, n_cols = cfg['D'], cfg['H'], cfg['dh'], cfg['d_hidden'], cfg['n_cols']
    NP = ((n_cols + 7) // 8) * 8          # pad tokens/batch to a sublane multiple (16)
    NPB = B * NP
    scale = 1.0 / math.sqrt(dh)

    def row128(v):
        v = jnp.asarray(v, jnp.float32).reshape(-1)
        return jnp.pad(v, (0, 128 - v.shape[0]))[None, :]

    def pad128(m):
        m = jnp.asarray(m, jnp.float32)
        return jnp.pad(m, ((0, 0), (0, 128 - m.shape[1])))

    # ---- tokenizer slab: [tok_weight tiled ; tok_bias tiled], rows padded to NP ----
    tw = jnp.pad(P['tok_weight'], ((0, NP - n_cols), (0, 0)))                    # (NP, D)
    tb = jnp.pad(jnp.concatenate([jnp.zeros((1, D), jnp.float32), P['tok_bias']], 0),
                 ((0, NP - n_cols), (0, 0)))                                     # (NP, D)
    tok_slab = jnp.concatenate([jnp.tile(tw, (B, 1)), jnp.tile(tb, (B, 1))], axis=0)

    # ---- param slab (1-row things, padded to 128 lanes) ----
    rows = [row128(P['lastnorm_g']), row128(P['lastnorm_b']),
            row128(P['head_w'][:, 0]), row128(P['head_b'])]
    for h in range(H):                                            # head output lane masks
        rows.append(row128(jnp.zeros((D,), jnp.float32).at[h * dh:(h + 1) * dh].set(1.0)))
    for L in P['layers']:
        rows.append(row128(L.get('norm0_g', jnp.zeros((D,), jnp.float32))))
        rows.append(row128(L.get('norm0_b', jnp.zeros((D,), jnp.float32))))
        rows.append(row128(jnp.concatenate([L['bh'], L['bv']])))  # bhv (2D)
        rows.append(row128(L['bo']))
        rows.append(row128(L['norm1_g']))
        rows.append(row128(L['norm1_b']))
        rows.append(row128(L['b0']))                              # (2*d_hidden)
        rows.append(row128(L['b1']))
        for h in range(H):                                        # rel*scale per head
            rows.append(row128(jnp.zeros((D,), jnp.float32)
                               .at[h * dh:(h + 1) * dh].set(L['rel'][h] * scale)))
    param_slab = jnp.concatenate(rows, axis=0)                    # (P_GLOBAL+12*L, 128)

    # ---- weight slab: [Whv; Wo; W0; W1] per layer, zero-padded to 128 lanes ----
    wrows = []
    for L in P['layers']:
        wrows.append(pad128(jnp.concatenate([L['Wh'], L['Wv']], axis=1)))   # (D, 2D)
        wrows.append(pad128(L['Wo']))                                       # (D, D)
        wrows.append(pad128(L['W0']))                                       # (D, 2*d_hidden)
        wrows.append(pad128(L['W1']))                                       # (d_hidden, D)
    w_slab = jnp.concatenate(wrows, axis=0)                                 # (L*(3D+dh), 128)

    # ---- mask slab: per (layer, head) (B*NP, B*NP): adjacency mask on the
    #      per-batch diagonal blocks, -1e9 for padding / cross-batch keys ----
    mblocks = []
    for L in P['layers']:
        core = compute_adj_mask(L['col_head'], L['col_tail'], L['top_bias'],
                                n_cols, n_cols)                              # (H, n_cols, n_cols)
        core = jnp.pad(core, ((0, 0), (0, NP - n_cols), (0, NP - n_cols)),
                       constant_values=-1e9)                                 # (H, NP, NP)
        big = jnp.full((H, NPB, NPB), -1e9, jnp.float32)
        for b in range(B):
            big = big.at[:, b * NP:(b + 1) * NP, b * NP:(b + 1) * NP].set(core)
        mblocks.append(big.reshape(H * NPB, NPB))
    mask_slab = jnp.concatenate(mblocks, axis=0)                             # (L*H*NPB, NPB)

    return dict(cfg=dict(cfg, NP=NP),
                layer_has_norm0=tuple('norm0_g' in L for L in P['layers']),
                tok_slab=tok_slab, param_slab=param_slab,
                w_slab=w_slab, mask_slab=mask_slab)


# --------------------------------------------------------------------------
# Wrapper
# --------------------------------------------------------------------------
def _full_spec(a):
    """Whole-array block, replicated across the (size-1) grid."""
    return pl.BlockSpec(a.shape, lambda i: (0, 0))


def pallas_forward(x, S):
    cfg = S['cfg']
    D, H, dh, d_hidden, n_cols, NP = (cfg['D'], cfg['H'], cfg['dh'],
                                      cfg['d_hidden'], cfg['n_cols'], cfg['NP'])
    B = x.shape[0]
    NPB = B * NP

    # Tiny data-dependent glue: [1 | x | 0-pad] column, pre-broadcast to D lanes.
    xt = jnp.concatenate([jnp.ones((B, 1), jnp.float32), x.astype(jnp.float32),
                          jnp.zeros((B, NP - n_cols), jnp.float32)], axis=1)   # (B, NP)
    x_slab = jnp.broadcast_to(xt.reshape(NPB, 1), (NPB, D))

    args = (x_slab, S['tok_slab'], S['param_slab'], S['w_slab'], S['mask_slab'])
    kernel = partial(t2g_fused_kernel, B=B, NP=NP, D=D, H=H, dh=dh,
                     d_hidden=d_hidden, layer_has_norm0=S['layer_has_norm0'])
    out = pl.pallas_call(
        kernel,
        out_shape=jax.ShapeDtypeStruct((B, 1), jnp.float32),
        grid=(1,),
        in_specs=[_full_spec(a) for a in args],
        out_specs=pl.BlockSpec((B, 1), lambda i: (0, 0)),
    )(*args)
    return out[:, 0]


# --------------------------------------------------------------------------
# Pure-JAX reference (mirror of the PyTorch semantics) for validation
# --------------------------------------------------------------------------
def layernorm(x, g, b, eps=1e-5):
    mu = jnp.mean(x, axis=-1, keepdims=True)
    var = jnp.mean((x - mu) ** 2, axis=-1, keepdims=True)
    return (x - mu) * lax.rsqrt(var + eps) * g + b


def reference_forward(x, P):
    cfg = P['cfg']
    D, H, dh, d_hidden, n_cols = cfg['D'], cfg['H'], cfg['dh'], cfg['d_hidden'], cfg['n_cols']
    B = x.shape[0]

    xt_in = jnp.concatenate([jnp.ones((B, 1), x.dtype), x], axis=1)
    h = P['tok_weight'][None] * xt_in[:, :, None]
    bias_full = jnp.concatenate([jnp.zeros((1, D), jnp.float32), P['tok_bias']], axis=0)
    h = h + bias_full[None]

    n_layers = len(P['layers'])
    for li, L in enumerate(P['layers']):
        is_last = li == n_layers - 1
        xr = layernorm(h, L['norm0_g'], L['norm0_b']) if 'norm0_g' in L else h
        nh = 1 if is_last else n_cols
        adj_mask = compute_adj_mask(L['col_head'], L['col_tail'], L['top_bias'], nh, n_cols)
        x_head = xr[:, :1] if is_last else xr

        f_head = x_head @ L['Wh'] + L['bh']
        f_tail = xr @ L['Wh'] + L['bh']
        f_v = xr @ L['Wv'] + L['bv']

        def split(t):
            return t.reshape(t.shape[0], t.shape[1], H, dh).transpose(0, 2, 1, 3)

        fh, ft, fv = split(f_head), split(f_tail), split(f_v)
        ws = jnp.einsum('bhqd,hd,bhkd->bhqk', fh, L['rel'], ft) / math.sqrt(dh)
        fr = jax.nn.softmax(ws + adj_mask[None], axis=-1)
        o = jnp.einsum('bhqk,bhkd->bhqd', fr, fv)
        o = o.transpose(0, 2, 1, 3).reshape(B, x_head.shape[1], D)
        attn = o @ L['Wo'] + L['bo']

        if is_last:
            h = h[:, :attn.shape[1]]
        h = h + attn

        xr = layernorm(h, L['norm1_g'], L['norm1_b'])
        z = xr @ L['W0'] + L['b0']
        a, b = z[..., :d_hidden], z[..., d_hidden:]
        y = (a * jnp.maximum(b, 0.0)) @ L['W1'] + L['b1']
        h = h + y

    out = h[:, 0]
    out = layernorm(out, P['lastnorm_g'], P['lastnorm_b'])
    out = jnp.maximum(out, 0.0)
    out = out @ P['head_w'] + P['head_b']
    return out[:, 0]


# --------------------------------------------------------------------------
# Deterministic parameter init (synthetic; mirrors module __init__ shapes)
# --------------------------------------------------------------------------
def init_params(key):
    cfg = dict(B=2, n_feat=8, n_cols=9, D=32, H=4, dh=8, d_hidden=64, n_layers=2,
               d_col=math.ceil(2 * math.log2(9)))
    keys = iter(jax.random.split(key, 128))

    def rnd(shape, scale=0.1):
        return (scale * jax.random.normal(next(keys), shape)).astype(jnp.float32)

    P = dict(cfg=cfg)
    P['tok_weight'] = rnd((cfg['n_cols'], cfg['D']))          # includes CLS row
    P['tok_bias'] = rnd((cfg['n_feat'], cfg['D']))

    layers = []
    for li in range(cfg['n_layers']):
        L = dict(
            Wh=rnd((cfg['D'], cfg['D'])), bh=jnp.zeros((cfg['D'],), jnp.float32),
            Wv=rnd((cfg['D'], cfg['D'])), bv=jnp.zeros((cfg['D'],), jnp.float32),
            Wo=rnd((cfg['D'], cfg['D'])), bo=jnp.zeros((cfg['D'],), jnp.float32),
            rel=jnp.ones((cfg['H'], cfg['dh']), jnp.float32),          # rel_emb init = ones
            col_head=rnd((cfg['H'], cfg['n_cols'], cfg['d_col']), 0.5),
            col_tail=rnd((cfg['H'], cfg['n_cols'], cfg['d_col']), 0.5),
            top_bias=jnp.zeros((), jnp.float32),
            norm1_g=1.0 + rnd((cfg['D'],), 0.05), norm1_b=rnd((cfg['D'],), 0.05),
            W0=rnd((cfg['D'], 2 * cfg['d_hidden'])), b0=rnd((2 * cfg['d_hidden'],), 0.05),
            W1=rnd((cfg['d_hidden'], cfg['D'])), b1=rnd((cfg['D'],), 0.05),
        )
        if li > 0:  # prenormalization=True: layer 0 has no norm0
            L['norm0_g'] = 1.0 + rnd((cfg['D'],), 0.05)
            L['norm0_b'] = rnd((cfg['D'],), 0.05)
        layers.append(L)
    P['layers'] = layers

    P['lastnorm_g'] = 1.0 + rnd((cfg['D'],), 0.05)
    P['lastnorm_b'] = rnd((cfg['D'],), 0.05)
    P['head_w'] = rnd((cfg['D'], 1))
    P['head_b'] = rnd((1,), 0.05)
    return P


# --------------------------------------------------------------------------
if __name__ == "__main__":
    key = jax.random.PRNGKey(0)
    pkey, xkey = jax.random.split(key)
    P = init_params(pkey)
    S = precompute_static(P, P['cfg']['B'])   # hoisted: masks + packed weight slabs
    x = jax.random.normal(xkey, (P['cfg']['B'], P['cfg']['n_feat']), dtype=jnp.float32)

    out = pallas_forward(x, S)
    out = jax.block_until_ready(out)

    ref = reference_forward(x, P)
    assert out.shape == (P['cfg']['B'],), out.shape
    if not bool(jnp.allclose(out, ref, atol=1e-2, rtol=1e-2)):
        raise AssertionError(
            f"mismatch: pallas={out} reference={ref} "
            f"max_abs_diff={float(jnp.max(jnp.abs(out - ref)))}")
    print("KERNEL_OK")
</pallas_src>

<mosaic_0001>
module attributes {stable_mosaic.version = 11 : i64} {
  func.func @t2g_fused_kernel(%arg0: i32, %arg1: memref<32x32xf32, #tpu.memory_space<vmem>>, %arg2: memref<64x32xf32, #tpu.memory_space<vmem>>, %arg3: memref<32x128xf32, #tpu.memory_space<vmem>>, %arg4: memref<320x128xf32, #tpu.memory_space<vmem>>, %arg5: memref<256x32xf32, #tpu.memory_space<vmem>>, %arg6: memref<2x1xf32, #tpu.memory_space<vmem>>) attributes {dimension_semantics = [#tpu.dimension_semantics<arbitrary>], iteration_bounds = array<i64: 1>, scalar_prefetch = 0 : i64, scratch_operands = 0 : i64, tpu.core_type = #tpu.core_type<tc>, window_params = [{pipeline_mode = #tpu.pipeline_mode<synchronous>, transform_indices = @transform_0, window_bounds = array<i64: 32, 32>}, {pipeline_mode = #tpu.pipeline_mode<synchronous>, transform_indices = @transform_1, window_bounds = array<i64: 64, 32>}, {pipeline_mode = #tpu.pipeline_mode<synchronous>, transform_indices = @transform_2, window_bounds = array<i64: 32, 128>}, {pipeline_mode = #tpu.pipeline_mode<synchronous>, transform_indices = @transform_3, window_bounds = array<i64: 320, 128>}, {pipeline_mode = #tpu.pipeline_mode<synchronous>, transform_indices = @transform_4, window_bounds = array<i64: 256, 32>}, {pipeline_mode = #tpu.pipeline_mode<synchronous>, transform_indices = @transform_5, window_bounds = array<i64: 2, 1>}]} {
    %c0 = arith.constant 0 : index
    %c0_0 = arith.constant 0 : index
    %0 = vector.load %arg1[%c0, %c0_0] : memref<32x32xf32, #tpu.memory_space<vmem>>, vector<32x32xf32>
    %c0_1 = arith.constant 0 : index
    %c0_2 = arith.constant 0 : index
    %1 = vector.load %arg2[%c0_1, %c0_2] : memref<64x32xf32, #tpu.memory_space<vmem>>, vector<32x32xf32>
    %2 = arith.mulf %0, %1 : vector<32x32xf32>
    %c32 = arith.constant 32 : index
    %c0_3 = arith.constant 0 : index
    %3 = vector.load %arg2[%c32, %c0_3] : memref<64x32xf32, #tpu.memory_space<vmem>>, vector<32x32xf32>
    %4 = arith.addf %2, %3 : vector<32x32xf32>
    %c0_4 = arith.constant 0 : index
    %c0_5 = arith.constant 0 : index
    %5 = vector.load %arg4[%c0_4, %c0_5] : memref<320x128xf32, #tpu.memory_space<vmem>>, vector<32x64xf32>
    %cst = arith.constant dense<0.000000e+00> : vector<32x64xf32>
    %6 = tpu.matmul %4, %5, %cst {dimension_numbers = #tpu.dot_dimension_numbers<[1], [0], [0], [1], [0, 0, 1, 1], [], []>} : vector<32x32xf32>, vector<32x64xf32>, vector<32x64xf32> -> vector<32x64xf32>
    %c10 = arith.constant 10 : index
    %c0_6 = arith.constant 0 : index
    %7 = vector.load %arg3[%c10, %c0_6] : memref<32x128xf32, #tpu.memory_space<vmem>>, vector<1x64xf32>
    %8 = vector.broadcast %7 : vector<1x64xf32> to vector<32x64xf32>
    %9 = arith.addf %6, %8 : vector<32x64xf32>
    %10 = vector.extract_strided_slice %9 {offsets = [0, 0], sizes = [32, 32], strides = [1, 1]} : vector<32x64xf32> to vector<32x32xf32>
    %11 = vector.extract_strided_slice %9 {offsets = [0, 32], sizes = [32, 32], strides = [1, 1]} : vector<32x64xf32> to vector<32x32xf32>
    %c16 = arith.constant 16 : index
    %c0_7 = arith.constant 0 : index
    %12 = vector.load %arg3[%c16, %c0_7] : memref<32x128xf32, #tpu.memory_space<vmem>>, vector<1x32xf32>
    %13 = vector.broadcast %12 : vector<1x32xf32> to vector<32x32xf32>
    %14 = arith.mulf %10, %13 : vector<32x32xf32>
    %c17 = arith.constant 17 : index
    %c0_8 = arith.constant 0 : index
    %15 = vector.load %arg3[%c17, %c0_8] : memref<32x128xf32, #tpu.memory_space<vmem>>, vector<1x32xf32>
    %16 = vector.broadcast %15 : vector<1x32xf32> to vector<32x32xf32>
    %17 = arith.mulf %10, %16 : vector<32x32xf32>
    %c18 = arith.constant 18 : index
    %c0_9 = arith.constant 0 : index
    %18 = vector.load %arg3[%c18, %c0_9] : memref<32x128xf32, #tpu.memory_space<vmem>>, vector<1x32xf32>
    %19 = vector.broadcast %18 : vector<1x32xf32> to vector<32x32xf32>
    %20 = arith.mulf %10, %19 : vector<32x32xf32>
    %c19 = arith.constant 19 : index
    %c0_10 = arith.constant 0 : index
    %21 = vector.load %arg3[%c19, %c0_10] : memref<32x128xf32, #tpu.memory_space<vmem>>, vector<1x32xf32>
    %22 = vector.broadcast %21 : vector<1x32xf32> to vector<32x32xf32>
    %23 = arith.mulf %10, %22 : vector<32x32xf32>
    %24 = tpu.concatenate %14, %17, %20, %23 in 0 : vector<32x32xf32>, vector<32x32xf32>, vector<32x32xf32>, vector<32x32xf32> -> vector<128x32xf32>
    %cst_11 = arith.constant dense<0.000000e+00> : vector<128x32xf32>
    %25 = tpu.matmul %24, %10, %cst_11 {dimension_numbers = #tpu.dot_dimension_numbers<[1], [1], [0], [0], [0, 0, 1, 0], [], []>} : vector<128x32xf32>, vector<32x32xf32>, vector<128x32xf32> -> vector<128x32xf32>
    %c0_12 = arith.constant 0 : index
    %c0_13 = arith.constant 0 : index
    %26 = vector.load %arg5[%c0_12, %c0_13] : memref<256x32xf32, #tpu.memory_space<vmem>>, vector<128x32xf32>
    %27 = arith.addf %25, %26 : vector<128x32xf32>
    %cst_14 = arith.constant dense<0xFF800000> : vector<128xf32>
    %28 = vector.multi_reduction <maximumf>, %27, %cst_14 [1] : vector<128x32xf32> to vector<128xf32>
    %29 = vector.shape_cast %28 : vector<128xf32> to vector<128x1xf32>
    %30 = vector.broadcast %29 : vector<128x1xf32> to vector<128x32xf32>
    %31 = arith.subf %27, %30 : vector<128x32xf32>
    %32 = math.exp %31 : vector<128x32xf32>
    %cst_15 = arith.constant dense<0.000000e+00> : vector<128xf32>
    %33 = vector.multi_reduction <add>, %32, %cst_15 [1] : vector<128x32xf32> to vector<128xf32>
    %34 = vector.shape_cast %33 : vector<128xf32> to vector<128x1xf32>
    %35 = tpu.reciprocal %34 {approx = true} : vector<128x1xf32> -> vector<128x1xf32>
    %36 = vector.broadcast %35 : vector<128x1xf32> to vector<128x32xf32>
    %37 = arith.mulf %32, %36 : vector<128x32xf32>
    %cst_16 = arith.constant dense<0.000000e+00> : vector<128x32xf32>
    %38 = tpu.matmul %37, %11, %cst_16 {dimension_numbers = #tpu.dot_dimension_numbers<[1], [0], [0], [1], [0, 0, 1, 1], [], []>} : vector<128x32xf32>, vector<32x32xf32>, vector<128x32xf32> -> vector<128x32xf32>
    %39 = vector.extract_strided_slice %38 {offsets = [0, 0], sizes = [32, 32], strides = [1, 1]} : vector<128x32xf32> to vector<32x32xf32>
    %c4 = arith.constant 4 : index
    %c0_17 = arith.constant 0 : index
    %40 = vector.load %arg3[%c4, %c0_17] : memref<32x128xf32, #tpu.memory_space<vmem>>, vector<1x32xf32>
    %41 = vector.broadcast %40 : vector<1x32xf32> to vector<32x32xf32>
    %42 = arith.mulf %39, %41 : vector<32x32xf32>
    %43 = vector.extract_strided_slice %38 {offsets = [32, 0], sizes = [32, 32], strides = [1, 1]} : vector<128x32xf32> to vector<32x32xf32>
    %c5 = arith.constant 5 : index
    %c0_18 = arith.constant 0 : index
    %44 = vector.load %arg3[%c5, %c0_18] : memref<32x128xf32, #tpu.memory_space<vmem>>, vector<1x32xf32>
    %45 = vector.broadcast %44 : vector<1x32xf32> to vector<32x32xf32>
    %46 = arith.mulf %43, %45 : vector<32x32xf32>
    %47 = arith.addf %42, %46 : vector<32x32xf32>
    %48 = vector.extract_strided_slice %38 {offsets = [64, 0], sizes = [32, 32], strides = [1, 1]} : vector<128x32xf32> to vector<32x32xf32>
    %c6 = arith.constant 6 : index
    %c0_19 = arith.constant 0 : index
    %49 = vector.load %arg3[%c6, %c0_19] : memref<32x128xf32, #tpu.memory_space<vmem>>, vector<1x32xf32>
    %50 = vector.broadcast %49 : vector<1x32xf32> to vector<32x32xf32>
    %51 = arith.mulf %48, %50 : vector<32x32xf32>
    %52 = arith.addf %47, %51 : vector<32x32xf32>
    %53 = vector.extract_strided_slice %38 {offsets = [96, 0], sizes = [32, 32], strides = [1, 1]} : vector<128x32xf32> to vector<32x32xf32>
    %c7 = arith.constant 7 : index
    %c0_20 = arith.constant 0 : index
    %54 = vector.load %arg3[%c7, %c0_20] : memref<32x128xf32, #tpu.memory_space<vmem>>, vector<1x32xf32>
    %55 = vector.broadcast %54 : vector<1x32xf32> to vector<32x32xf32>
    %56 = arith.mulf %53, %55 : vector<32x32xf32>
    %57 = arith.addf %52, %56 : vector<32x32xf32>
    %c32_21 = arith.constant 32 : index
    %c0_22 = arith.constant 0 : index
    %58 = vector.load %arg4[%c32_21, %c0_22] : memref<320x128xf32, #tpu.memory_space<vmem>>, vector<32x32xf32>
    %cst_23 = arith.constant dense<0.000000e+00> : vector<32x32xf32>
    %59 = tpu.matmul %57, %58, %cst_23 {dimension_numbers = #tpu.dot_dimension_numbers<[1], [0], [0], [1], [0, 0, 1, 1], [], []>} : vector<32x32xf32>, vector<32x32xf32>, vector<32x32xf32> -> vector<32x32xf32>
    %c11 = arith.constant 11 : index
    %c0_24 = arith.constant 0 : index
    %60 = vector.load %arg3[%c11, %c0_24] : memref<32x128xf32, #tpu.memory_space<vmem>>, vector<1x32xf32>
    %61 = vector.broadcast %60 : vector<1x32xf32> to vector<32x32xf32>
    %62 = arith.addf %59, %61 : vector<32x32xf32>
    %63 = arith.addf %4, %62 : vector<32x32xf32>
    %c12 = arith.constant 12 : index
    %c0_25 = arith.constant 0 : index
    %64 = vector.load %arg3[%c12, %c0_25] : memref<32x128xf32, #tpu.memory_space<vmem>>, vector<1x32xf32>
    %c13 = arith.constant 13 : index
    %c0_26 = arith.constant 0 : index
    %65 = vector.load %arg3[%c13, %c0_26] : memref<32x128xf32, #tpu.memory_space<vmem>>, vector<1x32xf32>
    %cst_27 = arith.constant dense<0.000000e+00> : vector<32xf32>
    %66 = vector.multi_reduction <add>, %63, %cst_27 [1] : vector<32x32xf32> to vector<32xf32>
    %67 = vector.shape_cast %66 : vector<32xf32> to vector<32x1xf32>
    %cst_28 = arith.constant 3.200000e+01 : f32
    %68 = vector.broadcast %cst_28 : f32 to vector<32x1xf32>
    %69 = arith.divf %67, %68 : vector<32x1xf32>
    %70 = vector.broadcast %69 : vector<32x1xf32> to vector<32x32xf32>
    %71 = arith.subf %63, %70 : vector<32x32xf32>
    %72 = arith.mulf %71, %71 : vector<32x32xf32>
    %cst_29 = arith.constant dense<0.000000e+00> : vector<32xf32>
    %73 = vector.multi_reduction <add>, %72, %cst_29 [1] : vector<32x32xf32> to vector<32xf32>
    %74 = vector.shape_cast %73 : vector<32xf32> to vector<32x1xf32>
    %cst_30 = arith.constant 3.200000e+01 : f32
    %75 = vector.broadcast %cst_30 : f32 to vector<32x1xf32>
    %76 = arith.divf %74, %75 : vector<32x1xf32>
    %77 = vector.broadcast %69 : vector<32x1xf32> to vector<32x32xf32>
    %78 = arith.subf %63, %77 : vector<32x32xf32>
    %cst_31 = arith.constant 9.99999974E-6 : f32
    %79 = vector.broadcast %cst_31 : f32 to vector<32x1xf32>
    %80 = arith.addf %76, %79 : vector<32x1xf32>
    %81 = math.rsqrt %80 : vector<32x1xf32>
    %82 = vector.broadcast %81 : vector<32x1xf32> to vector<32x32xf32>
    %83 = arith.mulf %78, %82 : vector<32x32xf32>
    %84 = vector.broadcast %64 : vector<1x32xf32> to vector<32x32xf32>
    %85 = arith.mulf %83, %84 : vector<32x32xf32>
    %86 = vector.broadcast %65 : vector<1x32xf32> to vector<32x32xf32>
    %87 = arith.addf %85, %86 : vector<32x32xf32>
    %c64 = arith.constant 64 : index
    %c0_32 = arith.constant 0 : index
    %88 = vector.load %arg4[%c64, %c0_32] : memref<320x128xf32, #tpu.memory_space<vmem>>, vector<32x128xf32>
    %cst_33 = arith.constant dense<0.000000e+00> : vector<32x128xf32>
    %89 = tpu.matmul %87, %88, %cst_33 {dimension_numbers = #tpu.dot_dimension_numbers<[1], [0], [0], [1], [0, 0, 1, 1], [], []>} : vector<32x32xf32>, vector<32x128xf32>, vector<32x128xf32> -> vector<32x128xf32>
    %c14 = arith.constant 14 : index
    %c0_34 = arith.constant 0 : index
    %90 = vector.load %arg3[%c14, %c0_34] : memref<32x128xf32, #tpu.memory_space<vmem>>, vector<1x128xf32>
    %91 = vector.broadcast %90 : vector<1x128xf32> to vector<32x128xf32>
    %92 = arith.addf %89, %91 : vector<32x128xf32>
    %93 = vector.extract_strided_slice %92 {offsets = [0, 0], sizes = [32, 64], strides = [1, 1]} : vector<32x128xf32> to vector<32x64xf32>
    %94 = vector.extract_strided_slice %92 {offsets = [0, 64], sizes = [32, 64], strides = [1, 1]} : vector<32x128xf32> to vector<32x64xf32>
    %cst_35 = arith.constant 0.000000e+00 : f32
    %95 = vector.broadcast %cst_35 : f32 to vector<32x64xf32>
    %96 = arith.maximumf %94, %95 : vector<32x64xf32>
    %97 = arith.mulf %93, %96 : vector<32x64xf32>
    %c96 = arith.constant 96 : index
    %c0_36 = arith.constant 0 : index
    %98 = vector.load %arg4[%c96, %c0_36] : memref<320x128xf32, #tpu.memory_space<vmem>>, vector<64x32xf32>
    %cst_37 = arith.constant dense<0.000000e+00> : vector<32x32xf32>
    %99 = tpu.matmul %97, %98, %cst_37 {dimension_numbers = #tpu.dot_dimension_numbers<[1], [0], [0], [1], [0, 0, 1, 1], [], []>} : vector<32x64xf32>, vector<64x32xf32>, vector<32x32xf32> -> vector<32x32xf32>
    %100 = arith.addf %63, %99 : vector<32x32xf32>
    %c15 = arith.constant 15 : index
    %c0_38 = arith.constant 0 : index
    %101 = vector.load %arg3[%c15, %c0_38] : memref<32x128xf32, #tpu.memory_space<vmem>>, vector<1x32xf32>
    %102 = vector.broadcast %101 : vector<1x32xf32> to vector<32x32xf32>
    %103 = arith.addf %100, %102 : vector<32x32xf32>
    %c20 = arith.constant 20 : index
    %c0_39 = arith.constant 0 : index
    %104 = vector.load %arg3[%c20, %c0_39] : memref<32x128xf32, #tpu.memory_space<vmem>>, vector<1x32xf32>
    %c21 = arith.constant 21 : index
    %c0_40 = arith.constant 0 : index
    %105 = vector.load %arg3[%c21, %c0_40] : memref<32x128xf32, #tpu.memory_space<vmem>>, vector<1x32xf32>
    %cst_41 = arith.constant dense<0.000000e+00> : vector<32xf32>
    %106 = vector.multi_reduction <add>, %103, %cst_41 [1] : vector<32x32xf32> to vector<32xf32>
    %107 = vector.shape_cast %106 : vector<32xf32> to vector<32x1xf32>
    %cst_42 = arith.constant 3.200000e+01 : f32
    %108 = vector.broadcast %cst_42 : f32 to vector<32x1xf32>
    %109 = arith.divf %107, %108 : vector<32x1xf32>
    %110 = vector.broadcast %109 : vector<32x1xf32> to vector<32x32xf32>
    %111 = arith.subf %103, %110 : vector<32x32xf32>
    %112 = arith.mulf %111, %111 : vector<32x32xf32>
    %cst_43 = arith.constant dense<0.000000e+00> : vector<32xf32>
    %113 = vector.multi_reduction <add>, %112, %cst_43 [1] : vector<32x32xf32> to vector<32xf32>
    %114 = vector.shape_cast %113 : vector<32xf32> to vector<32x1xf32>
    %cst_44 = arith.constant 3.200000e+01 : f32
    %115 = vector.broadcast %cst_44 : f32 to vector<32x1xf32>
    %116 = arith.divf %114, %115 : vector<32x1xf32>
    %117 = vector.broadcast %109 : vector<32x1xf32> to vector<32x32xf32>
    %118 = arith.subf %103, %117 : vector<32x32xf32>
    %cst_45 = arith.constant 9.99999974E-6 : f32
    %119 = vector.broadcast %cst_45 : f32 to vector<32x1xf32>
    %120 = arith.addf %116, %119 : vector<32x1xf32>
    %121 = math.rsqrt %120 : vector<32x1xf32>
    %122 = vector.broadcast %121 : vector<32x1xf32> to vector<32x32xf32>
    %123 = arith.mulf %118, %122 : vector<32x32xf32>
    %124 = vector.broadcast %104 : vector<1x32xf32> to vector<32x32xf32>
    %125 = arith.mulf %123, %124 : vector<32x32xf32>
    %126 = vector.broadcast %105 : vector<1x32xf32> to vector<32x32xf32>
    %127 = arith.addf %125, %126 : vector<32x32xf32>
    %c160 = arith.constant 160 : index
    %c0_46 = arith.constant 0 : index
    %128 = vector.load %arg4[%c160, %c0_46] : memref<320x128xf32, #tpu.memory_space<vmem>>, vector<32x64xf32>
    %cst_47 = arith.constant dense<0.000000e+00> : vector<32x64xf32>
    %129 = tpu.matmul %127, %128, %cst_47 {dimension_numbers = #tpu.dot_dimension_numbers<[1], [0], [0], [1], [0, 0, 1, 1], [], []>} : vector<32x32xf32>, vector<32x64xf32>, vector<32x64xf32> -> vector<32x64xf32>
    %c22 = arith.constant 22 : index
    %c0_48 = arith.constant 0 : index
    %130 = vector.load %arg3[%c22, %c0_48] : memref<32x128xf32, #tpu.memory_space<vmem>>, vector<1x64xf32>
    %131 = vector.broadcast %130 : vector<1x64xf32> to vector<32x64xf32>
    %132 = arith.addf %129, %131 : vector<32x64xf32>
    %133 = vector.extract_strided_slice %132 {offsets = [0, 0], sizes = [32, 32], strides = [1, 1]} : vector<32x64xf32> to vector<32x32xf32>
    %134 = vector.extract_strided_slice %132 {offsets = [0, 32], sizes = [32, 32], strides = [1, 1]} : vector<32x64xf32> to vector<32x32xf32>
    %c28 = arith.constant 28 : index
    %c0_49 = arith.constant 0 : index
    %135 = vector.load %arg3[%c28, %c0_49] : memref<32x128xf32, #tpu.memory_space<vmem>>, vector<1x32xf32>
    %136 = vector.broadcast %135 : vector<1x32xf32> to vector<32x32xf32>
    %137 = arith.mulf %133, %136 : vector<32x32xf32>
    %c29 = arith.constant 29 : index
    %c0_50 = arith.constant 0 : index
    %138 = vector.load %arg3[%c29, %c0_50] : memref<32x128xf32, #tpu.memory_space<vmem>>, vector<1x32xf32>
    %139 = vector.broadcast %138 : vector<1x32xf32> to vector<32x32xf32>
    %140 = arith.mulf %133, %139 : vector<32x32xf32>
    %c30 = arith.constant 30 : index
    %c0_51 = arith.constant 0 : index
    %141 = vector.load %arg3[%c30, %c0_51] : memref<32x128xf32, #tpu.memory_space<vmem>>, vector<1x32xf32>
    %142 = vector.broadcast %141 : vector<1x32xf32> to vector<32x32xf32>
    %143 = arith.mulf %133, %142 : vector<32x32xf32>
    %c31 = arith.constant 31 : index
    %c0_52 = arith.constant 0 : index
    %144 = vector.load %arg3[%c31, %c0_52] : memref<32x128xf32, #tpu.memory_space<vmem>>, vector<1x32xf32>
    %145 = vector.broadcast %144 : vector<1x32xf32> to vector<32x32xf32>
    %146 = arith.mulf %133, %145 : vector<32x32xf32>
    %147 = tpu.concatenate %137, %140, %143, %146 in 0 : vector<32x32xf32>, vector<32x32xf32>, vector<32x32xf32>, vector<32x32xf32> -> vector<128x32xf32>
    %cst_53 = arith.constant dense<0.000000e+00> : vector<128x32xf32>
    %148 = tpu.matmul %147, %133, %cst_53 {dimension_numbers = #tpu.dot_dimension_numbers<[1], [1], [0], [0], [0, 0, 1, 0], [], []>} : vector<128x32xf32>, vector<32x32xf32>, vector<128x32xf32> -> vector<128x32xf32>
    %c128 = arith.constant 128 : index
    %c0_54 = arith.constant 0 : index
    %149 = vector.load %arg5[%c128, %c0_54] : memref<256x32xf32, #tpu.memory_space<vmem>>, vector<128x32xf32>
    %150 = arith.addf %148, %149 : vector<128x32xf32>
    %cst_55 = arith.constant dense<0xFF800000> : vector<128xf32>
    %151 = vector.multi_reduction <maximumf>, %150, %cst_55 [1] : vector<128x32xf32> to vector<128xf32>
    %152 = vector.shape_cast %151 : vector<128xf32> to vector<128x1xf32>
    %153 = vector.broadcast %152 : vector<128x1xf32> to vector<128x32xf32>
    %154 = arith.subf %150, %153 : vector<128x32xf32>
    %155 = math.exp %154 : vector<128x32xf32>
    %cst_56 = arith.constant dense<0.000000e+00> : vector<128xf32>
    %156 = vector.multi_reduction <add>, %155, %cst_56 [1] : vector<128x32xf32> to vector<128xf32>
    %157 = vector.shape_cast %156 : vector<128xf32> to vector<128x1xf32>
    %158 = tpu.reciprocal %157 {approx = true} : vector<128x1xf32> -> vector<128x1xf32>
    %159 = vector.broadcast %158 : vector<128x1xf32> to vector<128x32xf32>
    %160 = arith.mulf %155, %159 : vector<128x32xf32>
    %cst_57 = arith.constant dense<0.000000e+00> : vector<128x32xf32>
    %161 = tpu.matmul %160, %134, %cst_57 {dimension_numbers = #tpu.dot_dimension_numbers<[1], [0], [0], [1], [0, 0, 1, 1], [], []>} : vector<128x32xf32>, vector<32x32xf32>, vector<128x32xf32> -> vector<128x32xf32>
    %162 = vector.extract_strided_slice %161 {offsets = [0, 0], sizes = [32, 32], strides = [1, 1]} : vector<128x32xf32> to vector<32x32xf32>
    %c4_58 = arith.constant 4 : index
    %c0_59 = arith.constant 0 : index
    %163 = vector.load %arg3[%c4_58, %c0_59] : memref<32x128xf32, #tpu.memory_space<vmem>>, vector<1x32xf32>
    %164 = vector.broadcast %163 : vector<1x32xf32> to vector<32x32xf32>
    %165 = arith.mulf %162, %164 : vector<32x32xf32>
    %166 = vector.extract_strided_slice %161 {offsets = [32, 0], sizes = [32, 32], strides = [1, 1]} : vector<128x32xf32> to vector<32x32xf32>
    %c5_60 = arith.constant 5 : index
    %c0_61 = arith.constant 0 : index
    %167 = vector.load %arg3[%c5_60, %c0_61] : memref<32x128xf32, #tpu.memory_space<vmem>>, vector<1x32xf32>
    %168 = vector.broadcast %167 : vector<1x32xf32> to vector<32x32xf32>
    %169 = arith.mulf %166, %168 : vector<32x32xf32>
    %170 = arith.addf %165, %169 : vector<32x32xf32>
    %171 = vector.extract_strided_slice %161 {offsets = [64, 0], sizes = [32, 32], strides = [1, 1]} : vector<128x32xf32> to vector<32x32xf32>
    %c6_62 = arith.constant 6 : index
    %c0_63 = arith.constant 0 : index
    %172 = vector.load %arg3[%c6_62, %c0_63] : memref<32x128xf32, #tpu.memory_space<vmem>>, vector<1x32xf32>
    %173 = vector.broadcast %172 : vector<1x32xf32> to vector<32x32xf32>
    %174 = arith.mulf %171, %173 : vector<32x32xf32>
    %175 = arith.addf %170, %174 : vector<32x32xf32>
    %176 = vector.extract_strided_slice %161 {offsets = [96, 0], sizes = [32, 32], strides = [1, 1]} : vector<128x32xf32> to vector<32x32xf32>
    %c7_64 = arith.constant 7 : index
    %c0_65 = arith.constant 0 : index
    %177 = vector.load %arg3[%c7_64, %c0_65] : memref<32x128xf32, #tpu.memory_space<vmem>>, vector<1x32xf32>
    %178 = vector.broadcast %177 : vector<1x32xf32> to vector<32x32xf32>
    %179 = arith.mulf %176, %178 : vector<32x32xf32>
    %180 = arith.addf %175, %179 : vector<32x32xf32>
    %c192 = arith.constant 192 : index
    %c0_66 = arith.constant 0 : index
    %181 = vector.load %arg4[%c192, %c0_66] : memref<320x128xf32, #tpu.memory_space<vmem>>, vector<32x32xf32>
    %cst_67 = arith.constant dense<0.000000e+00> : vector<32x32xf32>
    %182 = tpu.matmul %180, %181, %cst_67 {dimension_numbers = #tpu.dot_dimension_numbers<[1], [0], [0], [1], [0, 0, 1, 1], [], []>} : vector<32x32xf32>, vector<32x32xf32>, vector<32x32xf32> -> vector<32x32xf32>
    %c23 = arith.constant 23 : index
    %c0_68 = arith.constant 0 : index
    %183 = vector.load %arg3[%c23, %c0_68] : memref<32x128xf32, #tpu.memory_space<vmem>>, vector<1x32xf32>
    %184 = vector.broadcast %183 : vector<1x32xf32> to vector<32x32xf32>
    %185 = arith.addf %182, %184 : vector<32x32xf32>
    %186 = arith.addf %103, %185 : vector<32x32xf32>
    %c24 = arith.constant 24 : index
    %c0_69 = arith.constant 0 : index
    %187 = vector.load %arg3[%c24, %c0_69] : memref<32x128xf32, #tpu.memory_space<vmem>>, vector<1x32xf32>
    %c25 = arith.constant 25 : index
    %c0_70 = arith.constant 0 : index
    %188 = vector.load %arg3[%c25, %c0_70] : memref<32x128xf32, #tpu.memory_space<vmem>>, vector<1x32xf32>
    %cst_71 = arith.constant dense<0.000000e+00> : vector<32xf32>
    %189 = vector.multi_reduction <add>, %186, %cst_71 [1] : vector<32x32xf32> to vector<32xf32>
    %190 = vector.shape_cast %189 : vector<32xf32> to vector<32x1xf32>
    %cst_72 = arith.constant 3.200000e+01 : f32
    %191 = vector.broadcast %cst_72 : f32 to vector<32x1xf32>
    %192 = arith.divf %190, %191 : vector<32x1xf32>
    %193 = vector.broadcast %192 : vector<32x1xf32> to vector<32x32xf32>
    %194 = arith.subf %186, %193 : vector<32x32xf32>
    %195 = arith.mulf %194, %194 : vector<32x32xf32>
    %cst_73 = arith.constant dense<0.000000e+00> : vector<32xf32>
    %196 = vector.multi_reduction <add>, %195, %cst_73 [1] : vector<32x32xf32> to vector<32xf32>
    %197 = vector.shape_cast %196 : vector<32xf32> to vector<32x1xf32>
    %cst_74 = arith.constant 3.200000e+01 : f32
    %198 = vector.broadcast %cst_74 : f32 to vector<32x1xf32>
    %199 = arith.divf %197, %198 : vector<32x1xf32>
    %200 = vector.broadcast %192 : vector<32x1xf32> to vector<32x32xf32>
    %201 = arith.subf %186, %200 : vector<32x32xf32>
    %cst_75 = arith.constant 9.99999974E-6 : f32
    %202 = vector.broadcast %cst_75 : f32 to vector<32x1xf32>
    %203 = arith.addf %199, %202 : vector<32x1xf32>
    %204 = math.rsqrt %203 : vector<32x1xf32>
    %205 = vector.broadcast %204 : vector<32x1xf32> to vector<32x32xf32>
    %206 = arith.mulf %201, %205 : vector<32x32xf32>
    %207 = vector.broadcast %187 : vector<1x32xf32> to vector<32x32xf32>
    %208 = arith.mulf %206, %207 : vector<32x32xf32>
    %209 = vector.broadcast %188 : vector<1x32xf32> to vector<32x32xf32>
    %210 = arith.addf %208, %209 : vector<32x32xf32>
    %c224 = arith.constant 224 : index
    %c0_76 = arith.constant 0 : index
    %211 = vector.load %arg4[%c224, %c0_76] : memref<320x128xf32, #tpu.memory_space<vmem>>, vector<32x128xf32>
    %cst_77 = arith.constant dense<0.000000e+00> : vector<32x128xf32>
    %212 = tpu.matmul %210, %211, %cst_77 {dimension_numbers = #tpu.dot_dimension_numbers<[1], [0], [0], [1], [0, 0, 1, 1], [], []>} : vector<32x32xf32>, vector<32x128xf32>, vector<32x128xf32> -> vector<32x128xf32>
    %c26 = arith.constant 26 : index
    %c0_78 = arith.constant 0 : index
    %213 = vector.load %arg3[%c26, %c0_78] : memref<32x128xf32, #tpu.memory_space<vmem>>, vector<1x128xf32>
    %214 = vector.broadcast %213 : vector<1x128xf32> to vector<32x128xf32>
    %215 = arith.addf %212, %214 : vector<32x128xf32>
    %216 = vector.extract_strided_slice %215 {offsets = [0, 0], sizes = [32, 64], strides = [1, 1]} : vector<32x128xf32> to vector<32x64xf32>
    %217 = vector.extract_strided_slice %215 {offsets = [0, 64], sizes = [32, 64], strides = [1, 1]} : vector<32x128xf32> to vector<32x64xf32>
    %cst_79 = arith.constant 0.000000e+00 : f32
    %218 = vector.broadcast %cst_79 : f32 to vector<32x64xf32>
    %219 = arith.maximumf %217, %218 : vector<32x64xf32>
    %220 = arith.mulf %216, %219 : vector<32x64xf32>
    %c256 = arith.constant 256 : index
    %c0_80 = arith.constant 0 : index
    %221 = vector.load %arg4[%c256, %c0_80] : memref<320x128xf32, #tpu.memory_space<vmem>>, vector<64x32xf32>
    %cst_81 = arith.constant dense<0.000000e+00> : vector<32x32xf32>
    %222 = tpu.matmul %220, %221, %cst_81 {dimension_numbers = #tpu.dot_dimension_numbers<[1], [0], [0], [1], [0, 0, 1, 1], [], []>} : vector<32x64xf32>, vector<64x32xf32>, vector<32x32xf32> -> vector<32x32xf32>
    %223 = arith.addf %186, %222 : vector<32x32xf32>
    %c27 = arith.constant 27 : index
    %c0_82 = arith.constant 0 : index
    %224 = vector.load %arg3[%c27, %c0_82] : memref<32x128xf32, #tpu.memory_space<vmem>>, vector<1x32xf32>
    %225 = vector.broadcast %224 : vector<1x32xf32> to vector<32x32xf32>
    %226 = arith.addf %223, %225 : vector<32x32xf32>
    %227 = vector.extract_strided_slice %226 {offsets = [0, 0], sizes = [1, 32], strides = [1, 1]} : vector<32x32xf32> to vector<1x32xf32>
    %228 = vector.extract_strided_slice %226 {offsets = [16, 0], sizes = [1, 32], strides = [1, 1]} : vector<32x32xf32> to vector<1x32xf32>
    %229 = tpu.concatenate %227, %228 in 0 : vector<1x32xf32>, vector<1x32xf32> -> vector<2x32xf32>
    %c0_83 = arith.constant 0 : index
    %c0_84 = arith.constant 0 : index
    %230 = vector.load %arg3[%c0_83, %c0_84] : memref<32x128xf32, #tpu.memory_space<vmem>>, vector<1x32xf32>
    %c1 = arith.constant 1 : index
    %c0_85 = arith.constant 0 : index
    %231 = vector.load %arg3[%c1, %c0_85] : memref<32x128xf32, #tpu.memory_space<vmem>>, vector<1x32xf32>
    %cst_86 = arith.constant dense<0.000000e+00> : vector<2xf32>
    %232 = vector.multi_reduction <add>, %229, %cst_86 [1] : vector<2x32xf32> to vector<2xf32>
    %233 = vector.shape_cast %232 : vector<2xf32> to vector<2x1xf32>
    %cst_87 = arith.constant 3.200000e+01 : f32
    %234 = vector.broadcast %cst_87 : f32 to vector<2x1xf32>
    %235 = arith.divf %233, %234 : vector<2x1xf32>
    %236 = vector.broadcast %235 : vector<2x1xf32> to vector<2x32xf32>
    %237 = arith.subf %229, %236 : vector<2x32xf32>
    %238 = arith.mulf %237, %237 : vector<2x32xf32>
    %cst_88 = arith.constant dense<0.000000e+00> : vector<2xf32>
    %239 = vector.multi_reduction <add>, %238, %cst_88 [1] : vector<2x32xf32> to vector<2xf32>
    %240 = vector.shape_cast %239 : vector<2xf32> to vector<2x1xf32>
    %cst_89 = arith.constant 3.200000e+01 : f32
    %241 = vector.broadcast %cst_89 : f32 to vector<2x1xf32>
    %242 = arith.divf %240, %241 : vector<2x1xf32>
    %243 = vector.broadcast %235 : vector<2x1xf32> to vector<2x32xf32>
    %244 = arith.subf %229, %243 : vector<2x32xf32>
    %cst_90 = arith.constant 9.99999974E-6 : f32
    %245 = vector.broadcast %cst_90 : f32 to vector<2x1xf32>
    %246 = arith.addf %242, %245 : vector<2x1xf32>
    %247 = math.rsqrt %246 : vector<2x1xf32>
    %248 = vector.broadcast %247 : vector<2x1xf32> to vector<2x32xf32>
    %249 = arith.mulf %244, %248 : vector<2x32xf32>
    %250 = vector.broadcast %230 : vector<1x32xf32> to vector<2x32xf32>
    %251 = arith.mulf %249, %250 : vector<2x32xf32>
    %252 = vector.broadcast %231 : vector<1x32xf32> to vector<2x32xf32>
    %253 = arith.addf %251, %252 : vector<2x32xf32>
    %cst_91 = arith.constant 0.000000e+00 : f32
    %254 = vector.broadcast %cst_91 : f32 to vector<2x32xf32>
    %255 = arith.maximumf %253, %254 : vector<2x32xf32>
    %c2 = arith.constant 2 : index
    %c0_92 = arith.constant 0 : index
    %256 = vector.load %arg3[%c2, %c0_92] : memref<32x128xf32, #tpu.memory_space<vmem>>, vector<1x32xf32>
    %257 = vector.broadcast %256 : vector<1x32xf32> to vector<2x32xf32>
    %258 = arith.mulf %255, %257 : vector<2x32xf32>
    %cst_93 = arith.constant dense<0.000000e+00> : vector<2xf32>
    %259 = vector.multi_reduction <add>, %258, %cst_93 [1] : vector<2x32xf32> to vector<2xf32>
    %260 = vector.shape_cast %259 : vector<2xf32> to vector<2x1xf32>
    %c3 = arith.constant 3 : index
    %c0_94 = arith.constant 0 : index
    %261 = vector.load %arg3[%c3, %c0_94] : memref<32x128xf32, #tpu.memory_space<vmem>>, vector<1x1xf32>
    %262 = vector.broadcast %261 : vector<1x1xf32> to vector<2x1xf32>
    %263 = arith.addf %260, %262 : vector<2x1xf32>
    %c0_95 = arith.constant 0 : index
    %c0_96 = arith.constant 0 : index
    %264 = vector.load %arg6[%c0_95, %c0_96] : memref<2x1xf32, #tpu.memory_space<vmem>>, vector<2x1xf32>
    tpu.vector_store %arg6[%c0_95, %c0_96], %263 {strides = array<i32>} : memref<2x1xf32, #tpu.memory_space<vmem>>, vector<2x1xf32>,
    return
  }
  func.func @transform_0(%arg0: i32) -> (i32, i32) {
    %c0_i32 = arith.constant 0 : i32
    %c0_i32_0 = arith.constant 0 : i32
    %c0_i32_1 = arith.constant 0 : i32
    return %c0_i32, %c0_i32_0 : i32, i32
  }
  func.func @transform_1(%arg0: i32) -> (i32, i32) {
    %c0_i32 = arith.constant 0 : i32
    %c0_i32_0 = arith.constant 0 : i32
    %c0_i32_1 = arith.constant 0 : i32
    return %c0_i32, %c0_i32_0 : i32, i32
  }
  func.func @transform_2(%arg0: i32) -> (i32, i32) {
    %c0_i32 = arith.constant 0 : i32
    %c0_i32_0 = arith.constant 0 : i32
    %c0_i32_1 = arith.constant 0 : i32
    return %c0_i32, %c0_i32_0 : i32, i32
  }
  func.func @transform_3(%arg0: i32) -> (i32, i32) {
    %c0_i32 = arith.constant 0 : i32
    %c0_i32_0 = arith.constant 0 : i32
    %c0_i32_1 = arith.constant 0 : i32
    return %c0_i32, %c0_i32_0 : i32, i32
  }
  func.func @transform_4(%arg0: i32) -> (i32, i32) {
    %c0_i32 = arith.constant 0 : i32
    %c0_i32_0 = arith.constant 0 : i32
    %c0_i32_1 = arith.constant 0 : i32
    return %c0_i32, %c0_i32_0 : i32, i32
  }
  func.func @transform_5(%arg0: i32) -> (i32, i32) {
    %c0_i32 = arith.constant 0 : i32
    %c0_i32_0 = arith.constant 0 : i32
    %c0_i32_1 = arith.constant 0 : i32
    return %c0_i32, %c0_i32_0 : i32, i32
  }
}

</mosaic_0001>

<bundles_post_ra>
// kernel: tpu_custom_call.1
= control target key start
LH: loop header
LB: loop body
LE: loop exit
PB: predicated region body
PF: predicated region fallthrough
CT: control target
= control target key end

     0   :  { %10 = vsyncpa [#allocation3], 0  ;;  %s3322_s18 = smov [#allocation2]   ;;  %s4228_s0 = inlined_call_operand.vmem [shape: f32[32,32], index: 0, kind: input, shape index: {}]   ;;  %s4229_s1 = inlined_call_operand.vmem [shape: f32[64,32], index: 1, kind: input, shape index: {}]   ;;  %s4230_s2 = inlined_call_operand.hbm [shape: f32[32,128], index: 2, kind: input, shape index: {}]   ;;  %s4231_s3 = inlined_call_operand.vmem [shape: f32[320,128], index: 3, kind: input, shape index: {}]   ;;  %s4232_s4 = inlined_call_operand.vmem [shape: f32[256,32], index: 4, kind: input, shape index: {}]   ;;  %s4233_s5 = inlined_call_operand.vmem [shape: f32[2,1], index: 5, kind: output, shape index: {}]  }
   0x1   :  { %s20_s19 = sshll.u32 %s3322_s18, 4  ;;  %s21_s19 = int_to_ptr.vmem [resolvable:$true] %s20_s19 }
   0x2   :  { %s3308_s20 = scalar_lea.vmem %s21_s19, 512  ;;  %p3313_p1 = scmp.lt.s32.totalorder %s21_s19, %s21_s19 }
   0x3   :  { %p3309_p0 = scmp.ne.s32.totalorder %s21_s19, %s3308_s20  ;;  %p3314_p2 = scmp.lt.s32.totalorder %s3308_s20, %s3308_s20 }
   0x5   :  { %p3315_p3 = por %p3314_p2, %p3313_p1 }
   0x7   :  { %p3316_p4 = pnand %p3315_p3, %p3309_p0 }
   0x9   :  { %3319 = shalt.err (!%p3316_p4)
}
   0xa   :  { %s3323_s21 = smov 128   ;;  %s3324_s22 = smov 8  }
   0xb   :  { %26 = dma.hbm_to_vmem [thread:$0]  %s4230_s2, 512, %s21_s19, [#allocation3], %s3323_s21, %s3323_s21, %s3324_s22  }
   0xc   :  { %3320 = dma.done.wait [#allocation3], 512  }
   0xd   :  { %3321 = vsyncadd [#allocation3], 4294966784  ;;  %v57_v0 = vld [vmem:[%s4231_s3 + $0x18] sm:$0xff]  ;;  %v56_v1 = vld [vmem:[%s4231_s3 + $0x10] sm:$0xff]  ;;  %vm63_vm0 = vcmask 261120   ;;  %s3325_s2 = smov 96  }
   0xe   :  { %2881 = vmatprep.subr.mxu1 %v57_v0  ;;  %v55_v2 = vld [vmem:[%s4231_s3 + $0x8] sm:$0xff]  ;;  %v34_v3 = vld [vmem:[%s4228_s0] sm:$0xff]  ;;  %v36_v12 = vld [vmem:[%s4228_s0 + $0x10] sm:$0xff]  ;;  %s3326_s13 = smov 64   ;;  %vm1166_vm1 = vcmask 523264   ;;  %vm2544_vm2 = vcmask 1040384  }
   0xf   :  { %v38_v4 = vld [vmem:[%s4229_s1] sm:$0xff]  ;;  %2882 = vmatpush3.msra.mxu1 %v57_v0  ;;  %v35_v8 = vld [vmem:[%s4228_s0 + $0x8] sm:$0xff]  ;;  %v40_v13 = vld [vmem:[%s4229_s1 + $0x10] sm:$0xff]  ;;  %vm2548_vm3 = vcmask 254976   ;;  %vm2588_vm4 = vcmask 1024  }
  0x10   :  { %v54_v5 = vld [vmem:[%s4231_s3] sm:$0xff]  ;;  %v42_v6 = vmul.f32 %v38_v4, %v34_v3  ;;  %v39_v9 = vld [vmem:[%s4229_s1 + $0x8] sm:$0xff]  ;;  %2883 = vmatprep.subr.mxu1 %v56_v1  ;;  %v44_v15 = vmul.f32 %v40_v13, %v36_v12  ;;  %v48_v16 = vld [vmem:[%s4229_s1 + $0x30] sm:$0xff] }
  0x11   :  { %v46_v7 = vld [vmem:[%s4229_s1 + $0x20] sm:$0xff]  ;;  %v43_v10 = vmul.f32 %v39_v9, %v35_v8  ;;  %v47_v11 = vld [vmem:[%s4229_s1 + $0x28] sm:$0xff]  ;;  %2884 = vmatpush3.msra.mxu1 %v56_v1  ;;  %v37_v17 = vld [vmem:[%s4228_s0 + $0x18] sm:$0xff] }
  0x12   :  { %v3396_v14 = vadd.f32 %v46_v7, %v42_v6  ;;  %v41_v18 = vld [vmem:[%s4229_s1 + $0x18] sm:$0xff]  ;;  %2885 = vmatprep.subr.mxu1 %v55_v2  ;;  %v3411_v21 = vadd.f32 %v48_v16, %v44_v15  ;;  %v2595_v25 = vld [vmem:[#allocation2 + $0xa] ss:$0 sm:$0xff]  ;;  %v2600_v29 = vld [vmem:[#allocation2 + $0x10] ss:$0 sm:$0xff] }
  0x13   :  { %v3407_v19 = vadd.f32 %v47_v11, %v43_v10  ;;  %v45_v20 = vmul.f32 %v41_v18, %v37_v17  ;;  %2886 = vmatpush3.msra.mxu1 %v55_v2  ;;  %v49_v22 = vld [vmem:[%s4229_s1 + $0x38] sm:$0xff]  ;;  %v2601_v38 = vld [vmem:[#allocation2 + $0x11] ss:$0 sm:$0xff]  ;;  %v2602_v43 = vld [vmem:[#allocation2 + $0x12] ss:$0 sm:$0xff] }
  0x14   :  { %2889 = vmatprep.mubr.msk.f32.mxu1 %vm63_vm0, %v3396_v14  ;;  %2887 = vmatprep.subr.mxu1 %v54_v5  ;;  %v2603_v48 = vld [vmem:[#allocation2 + $0x13] ss:$0 sm:$0xff]  ;;  %v198_v53 = vld [vmem:[%s4232_s4 + $0x8] sm:$0xff]  ;;  %v197_v55 = vld [vmem:[%s4232_s4] sm:$0xff] }
  0x15   :  { %2888 = vmatpush3.msra.mxu1 %v54_v5  ;;  %v3418_v23 = vadd.f32 %v49_v22, %v45_v20  ;;  %v200_v58 = vld [vmem:[%s4232_s4 + $0x18] sm:$0xff]  ;;  %v199_v62 = vld [vmem:[%s4232_s4 + $0x10] sm:$0xff]  ;;  %v202_v4 = vld [vmem:[%s4232_s4 + $0x28] sm:$0xff] }
  0x16   :  { %2890 = vmatmul.mubr.msk.f32.vlgmr.msra.gmra.mxu1 %vm63_vm0, %v3407_v19  ;;  %v201_v6 = vld [vmem:[%s4232_s4 + $0x20] sm:$0xff]  ;;  %v204_v11 = vld [vmem:[%s4232_s4 + $0x38] sm:$0xff]  ;;  %v203_v13 = vld [vmem:[%s4232_s4 + $0x30] sm:$0xff] }
  0x17   :  { %2892 = vmatprep.mubr.msk.f32.mxu1 %vm63_vm0, %v3411_v21  ;;  %v206_v22 = vld [vmem:[%s4232_s4 + $0x48] sm:$0xff] }
  0x1a   :  { %2893 = vmatmul.mubr.msk.f32.gmra.mxu1 %vm63_vm0, %v3418_v23 }
  0xd6   :  { %v2891_v24 = vpop.f32.mrf.mxu1 }
  0xd7   :  { %v3438_v34 = vadd.f32 %v2891_v24, %v2595_v25 }
  0xd8   :  { %v142_v26 = vpop.f32.mrf.mxu1 }
  0xd9   :  { %v3424_v27 = vadd.f32 %v2595_v25, %v142_v26  ;;  %v167_v35 = vmul.f32 %v2600_v29, %v3438_v34  ;;  %v176_v40 = vmul.f32 %v2601_v38, %v3438_v34  ;;  %v185_v45 = vmul.f32 %v2602_v43, %v3438_v34 }
  0xda   :  { %v2894_v28 = vpop.f32.mrf.mxu1  ;;  %v194_v50 = vmul.f32 %v2603_v48, %v3438_v34 }
  0xdb   :  { %v3426_v30 = vadd.f32 %v2894_v28, %v2595_v25  ;;  %v166_v31 = vmul.f32 %v2600_v29, %v3424_v27  ;;  %v175_v39 = vmul.f32 %v2601_v38, %v3424_v27  ;;  %v184_v44 = vmul.f32 %v2602_v43, %v3424_v27 }
  0xdc   :  { %v152_v32 = vpop.f32.mrf.mxu1  ;;  %v193_v49 = vmul.f32 %v2603_v48, %v3424_v27 }
  0xdd   :  { %v3429_v33 = vadd.f32 %v2595_v25, %v152_v32  ;;  %2895 = vmatprep.subr.msk.mxu1 %vm63_vm0, %v3426_v30  ;;  %2903 = vmatprep.mubr.msk.f32.mxu1 %vm63_vm0, %v166_v31  ;;  %v169_v37 = vmul.f32 %v2600_v29, %v3426_v30  ;;  %v178_v42 = vmul.f32 %v2601_v38, %v3426_v30  ;;  %v205_v25 = vld [vmem:[%s4232_s4 + $0x40] sm:$0xff] }
  0xde   :  { %2896 = vmatpush3.xpose.msk.msra.mxu1 %vm63_vm0, %v3426_v30  ;;  %v187_v47 = vmul.f32 %v2602_v43, %v3426_v30  ;;  %v196_v52 = vmul.f32 %v2603_v48, %v3426_v30 }
  0xdf   :  { %2897 = vmatprep.subr.msk.mxu1 %vm63_vm0, %v3429_v33  ;;  %v168_v36 = vmul.f32 %v2600_v29, %v3429_v33  ;;  %v177_v41 = vmul.f32 %v2601_v38, %v3429_v33  ;;  %v186_v46 = vmul.f32 %v2602_v43, %v3429_v33  ;;  %v195_v51 = vmul.f32 %v2603_v48, %v3429_v33  ;;  %v210_v43 = vld [vmem:[%s4232_s4 + $0x68] sm:$0xff] }
  0xe2   :  { %2898 = vmatpush3.xpose.msk.msra.mxu1 %vm63_vm0, %v3429_v33 }
  0xe3   :  { %2899 = vmatprep.subr.msk.mxu1 %vm63_vm0, %v3438_v34 }
  0xe6   :  { %2900 = vmatpush3.xpose.msk.msra.mxu1 %vm63_vm0, %v3438_v34 }
  0xe7   :  { %2901 = vmatprep.subr.msk.mxu1 %vm63_vm0, %v3424_v27 }
  0xea   :  { %2902 = vmatpush3.xpose.msk.msra.mxu1 %vm63_vm0, %v3424_v27 }
  0xed   :  { %2904 = vmatmul.mubr.msk.f32.vlgmr.msra.gmra.mxu1 %vm63_vm0, %v167_v35  ;;  %v208_v35 = vld [vmem:[%s4232_s4 + $0x58] sm:$0xff] }
  0xee   :  { %2906 = vmatprep.mubr.msk.f32.mxu1 %vm63_vm0, %v168_v36 }
  0xf1   :  { %2907 = vmatmul.mubr.msk.f32.gmra.mxu1 %vm63_vm0, %v169_v37  ;;  %v207_v37 = vld [vmem:[%s4232_s4 + $0x50] sm:$0xff] }
  0xf2   :  { %2909 = vmatprep.mubr.msk.f32.mxu1 %vm63_vm0, %v175_v39 }
  0xf5   :  { %2910 = vmatmul.mubr.msk.f32.gmra.mxu1 %vm63_vm0, %v176_v40 }
  0xf6   :  { %2912 = vmatprep.mubr.msk.f32.mxu1 %vm63_vm0, %v177_v41 }
  0xf9   :  { %2913 = vmatmul.mubr.msk.f32.gmra.mxu1 %vm63_vm0, %v178_v42 }
  0xfa   :  { %2915 = vmatprep.mubr.msk.f32.mxu1 %vm63_vm0, %v184_v44 }
  0xfd   :  { %2916 = vmatmul.mubr.msk.f32.gmra.mxu1 %vm63_vm0, %v185_v45  ;;  %v209_v45 = vld [vmem:[%s4232_s4 + $0x60] sm:$0xff] }
  0xfe   :  { %2918 = vmatprep.mubr.msk.f32.mxu1 %vm63_vm0, %v186_v46 }
 0x101   :  { %2919 = vmatmul.mubr.msk.f32.gmra.mxu1 %vm63_vm0, %v187_v47 }
 0x102   :  { %2921 = vmatprep.mubr.msk.f32.mxu1 %vm63_vm0, %v193_v49 }
 0x105   :  { %2922 = vmatmul.mubr.msk.f32.gmra.mxu1 %vm63_vm0, %v194_v50 }
 0x106   :  { %2924 = vmatprep.mubr.msk.f32.mxu1 %vm63_vm0, %v195_v51  ;;  %v212_v51 = vld [vmem:[%s4232_s4 + $0x78] sm:$0xff] }
 0x109   :  { %2925 = vmatmul.mubr.msk.f32.gmra.mxu1 %vm63_vm0, %v196_v52 }
 0x1ad   :  { %v2905_v54 = vpop.f32.mrf.mxu1 }
 0x1ae   :  { %v3486_v56 = vadd.f32 %v2905_v54, %v198_v53  ;;  %v211_v53 = vld [vmem:[%s4232_s4 + $0x70] sm:$0xff] }
 0x1af   :  { %v339_v57 = vpop.f32.mrf.mxu1 }
 0x1b0   :  { %v3491_v59 = vadd.f32 %v339_v57, %v197_v55  ;;  %v421_v60 = vsel %vm63_vm0, %v3486_v56, -inf }
 0x1b1   :  { %422 = vmax.xlane.f32.xlu0 %v421_v60  ;;  %v2908_v61 = vpop.f32.mrf.mxu1 }
 0x1b2   :  { %v3498_v63 = vadd.f32 %v2908_v61, %v200_v58  ;;  %v418_v3 = vsel %vm63_vm0, %v3491_v59, -inf }
 0x1b3   :  { %v349_v0 = vpop.f32.mrf.mxu1 }
 0x1b4   :  { %v3500_v1 = vadd.f32 %v349_v0, %v199_v62  ;;  %v427_v2 = vsel %vm63_vm0, %v3498_v63, -inf }
 0x1b5   :  { %428 = vmax.xlane.f32.xlu1 %v427_v2  ;;  %v2911_v5 = vpop.f32.mrf.mxu1  ;;  %419 = vmax.xlane.f32.xlu0 %v418_v3 }
 0x1b6   :  { %v3512_v8 = vadd.f32 %v2911_v5, %v202_v4  ;;  %v424_v10 = vsel %vm63_vm0, %v3500_v1, -inf }
 0x1b7   :  { %v359_v7 = vpop.f32.mrf.mxu1 }
 0x1b8   :  { %v3514_v9 = vadd.f32 %v359_v7, %v201_v6  ;;  %v433_v20 = vsel %vm63_vm0, %v3512_v8, -inf }
 0x1b9   :  { %v2914_v12 = vpop.f32.mrf.mxu1  ;;  %425 = vmax.xlane.f32.xlu1 %v424_v10 }
 0x1ba   :  { %v430_v15 = vsel %vm63_vm0, %v3514_v9, -inf  ;;  %v3526_v17 = vadd.f32 %v2914_v12, %v204_v11 }
 0x1bb   :  { %v369_v16 = vpop.f32.mrf.mxu1  ;;  %431 = vmax.xlane.f32.xlu0 %v430_v15 }
 0x1bc   :  { %v3528_v18 = vadd.f32 %v369_v16, %v203_v13  ;;  %v439_v32 = vsel %vm63_vm0, %v3526_v17, -inf }
 0x1bd   :  { %v2917_v24 = vpop.f32.mrf.mxu1  ;;  %434 = vmax.xlane.f32.xlu1 %v433_v20 }
 0x1be   :  { %v436_v26 = vsel %vm63_vm0, %v3528_v18, -inf  ;;  %v3540_v29 = vadd.f32 %v2917_v24, %v206_v22 }
 0x1bf   :  { %v379_v28 = vpop.f32.mrf.mxu1  ;;  %437 = vmax.xlane.f32.xlu0 %v436_v26 }
 0x1c0   :  { %v3542_v31 = vadd.f32 %v379_v28, %v205_v25  ;;  %v445_v42 = vsel %vm63_vm0, %v3540_v29, -inf }
 0x1c1   :  { %v2920_v36 = vpop.f32.mrf.mxu1  ;;  %440 = vmax.xlane.f32.xlu1 %v439_v32 }
 0x1c2   :  { %v442_v38 = vsel %vm63_vm0, %v3542_v31, -inf  ;;  %v3554_v40 = vadd.f32 %v2920_v36, %v208_v35 }
 0x1c3   :  { %v389_v39 = vpop.f32.mrf.mxu1  ;;  %443 = vmax.xlane.f32.xlu0 %v442_v38 }
 0x1c4   :  { %v3556_v41 = vadd.f32 %v389_v39, %v207_v37  ;;  %v451_v50 = vsel %vm63_vm0, %v3554_v40, -inf }
 0x1c5   :  { %v2923_v44 = vpop.f32.mrf.mxu1  ;;  %446 = vmax.xlane.f32.xlu1 %v445_v42 }
 0x1c6   :  { %v448_v46 = vsel %vm63_vm0, %v3556_v41, -inf  ;;  %v3568_v48 = vadd.f32 %v2923_v44, %v210_v43 }
 0x1c7   :  { %v399_v47 = vpop.f32.mrf.mxu1  ;;  %449 = vmax.xlane.f32.xlu0 %v448_v46 }
 0x1c8   :  { %v3570_v49 = vadd.f32 %v399_v47, %v209_v45  ;;  %v457_v60 = vsel %vm63_vm0, %v3568_v48, -inf }
 0x1c9   :  { %v2926_v52 = vpop.f32.mrf.mxu1  ;;  %452 = vmax.xlane.f32.xlu1 %v451_v50 }
 0x1ca   :  { %v454_v54 = vsel %vm63_vm0, %v3570_v49, -inf  ;;  %v3582_v57 = vadd.f32 %v2926_v52, %v212_v51 }
 0x1cb   :  { %v409_v55 = vpop.f32.mrf.mxu1  ;;  %455 = vmax.xlane.f32.xlu0 %v454_v54 }
 0x1cc   :  { %v3584_v58 = vadd.f32 %v409_v55, %v211_v53  ;;  %v463_v62 = vsel %vm63_vm0, %v3582_v57, -inf }
 0x1cd   :  { %458 = vmax.xlane.f32.xlu1 %v457_v60 }
 0x1ce   :  { %v460_v61 = vsel %vm63_vm0, %v3584_v58, -inf }
 0x1cf   :  { %461 = vmax.xlane.f32.xlu0 %v460_v61 }
 0x1d1   :  { %464 = vmax.xlane.f32.xlu1 %v463_v62 }
 0x1e2   :  { %598 = vrot.lane.b32.xlu1 %v3429_v33, %s3325_s2 }
 0x1e5   :  { %600 = vrot.lane.b32.xlu0 %v3426_v30, %s3325_s2 }
 0x23a   :  { %v423_v0 = vpop.xlane.xlu0 %422 }
 0x23b   :  { %v467_v2 = vsub.f32 %v3486_v56, %v423_v0 }
 0x23d   :  { %v484_v3 = vmul.f32 1.442695, %v467_v2 }
 0x23e   :  { %v429_v4 = vpop.xlane.xlu1 %428  ;;  %v420_v5 = vpop.xlane.xlu0 %419 }
 0x23f   :  { %3142 = vpow2.f32 %v484_v3  ;;  %v469_v6 = vsub.f32 %v3498_v63, %v429_v4  ;;  %v466_v7 = vsub.f32 %v3491_v59, %v420_v5 }
 0x241   :  { %v488_v10 = vmul.f32 1.442695, %v469_v6  ;;  %v482_v11 = vmul.f32 1.442695, %v466_v7 }
 0x242   :  { %v426_v12 = vpop.xlane.xlu1 %425 }
 0x243   :  { %3144 = vpow2.f32 %v488_v10  ;;  %v468_v33 = vsub.f32 %v3500_v1, %v426_v12 }
 0x244   :  { %3146 = vpow2.f32 %v482_v11  ;;  %v432_v13 = vpop.xlane.xlu0 %431 }
 0x245   :  { %v486_v30 = vmul.f32 1.442695, %v468_v33  ;;  %v470_v15 = vsub.f32 %v3514_v9, %v432_v13 }
 0x246   :  { %v435_v56 = vpop.xlane.xlu1 %434 }
 0x247   :  { %3148 = vpow2.f32 %v486_v30  ;;  %v490_v16 = vmul.f32 1.442695, %v470_v15  ;;  %v471_v20 = vsub.f32 %v3512_v8, %v435_v56 }
 0x248   :  { %v438_v22 = vpop.xlane.xlu0 %437 }
 0x249   :  { %v492_v63 = vmul.f32 1.442695, %v471_v20  ;;  %v472_v59 = vsub.f32 %v3528_v18, %v438_v22  ;;  %3150 = vpow2.f32 %v490_v16 }
 0x24a   :  { %v441_v24 = vpop.xlane.xlu1 %440 }
 0x24b   :  { %3152 = vpow2.f32 %v492_v63  ;;  %v494_v25 = vmul.f32 1.442695, %v472_v59  ;;  %v473_v1 = vsub.f32 %v3526_v17, %v441_v24 }
 0x24c   :  { %v3604_v26 = vpop.eup %3142  ;;  %v444_v28 = vpop.xlane.xlu0 %443 }
 0x24d   :  { %v496_v32 = vmul.f32 1.442695, %v473_v1  ;;  %v474_v9 = vsub.f32 %v3542_v31, %v444_v28  ;;  %v517_v35 = vsel %vm63_vm0, %v3604_v26, 0.0  ;;  %3154 = vpow2.f32 %v494_v25 }
 0x24e   :  { %518 = vadd.xlane.f32.xlu1 %v517_v35  ;;  %v447_v8 = vpop.xlane.xlu1 %446 }
 0x24f   :  { %3156 = vpow2.f32 %v496_v32  ;;  %v498_v18 = vmul.f32 1.442695, %v474_v9  ;;  %v475_v36 = vsub.f32 %v3540_v29, %v447_v8 }
 0x250   :  { %v3610_v37 = vpop.eup %3144  ;;  %v450_v38 = vpop.xlane.xlu0 %449 }
 0x251   :  { %v3612_v17 = vpop.eup %3146  ;;  %v500_v39 = vmul.f32 1.442695, %v475_v36  ;;  %v476_v42 = vsub.f32 %v3556_v41, %v450_v38  ;;  %v523_v31 = vsel %vm63_vm0, %v3610_v37, 0.0  ;;  %3158 = vpow2.f32 %v498_v18 }
 0x252   :  { %524 = vadd.xlane.f32.xlu1 %v523_v31  ;;  %v453_v43 = vpop.xlane.xlu1 %452  ;;  %v514_v44 = vsel %vm63_vm0, %v3612_v17, 0.0 }
 0x253   :  { %3160 = vpow2.f32 %v500_v39  ;;  %v502_v45 = vmul.f32 1.442695, %v476_v42  ;;  %v477_v29 = vsub.f32 %v3554_v40, %v453_v43  ;;  %515 = vadd.xlane.f32.xlu0 %v514_v44 }
 0x254   :  { %v3620_v46 = vpop.eup %3148  ;;  %v456_v47 = vpop.xlane.xlu0 %455 }
 0x255   :  { %v504_v50 = vmul.f32 1.442695, %v477_v29  ;;  %v520_v41 = vsel %vm63_vm0, %v3620_v46, 0.0  ;;  %3162 = vpow2.f32 %v502_v45  ;;  %v478_v30 = vsub.f32 %v3570_v49, %v456_v47 }
 0x256   :  { %v459_v51 = vpop.xlane.xlu1 %458  ;;  %v3624_v52 = vpop.eup %3150 }
 0x257   :  { %3164 = vpow2.f32 %v504_v50  ;;  %521 = vadd.xlane.f32.xlu0 %v520_v41  ;;  %v526_v60 = vsel %vm63_vm0, %v3624_v52, 0.0  ;;  %v479_v15 = vsub.f32 %v3568_v48, %v459_v51  ;;  %v506_v56 = vmul.f32 1.442695, %v478_v30 }
 0x258   :  { %v3626_v53 = vpop.eup %3152  ;;  %v462_v54 = vpop.xlane.xlu0 %461 }
 0x259   :  { %v529_v40 = vsel %vm63_vm0, %v3626_v53, 0.0  ;;  %v480_v16 = vsub.f32 %v3584_v58, %v462_v54  ;;  %v508_v20 = vmul.f32 1.442695, %v479_v15  ;;  %3166 = vpow2.f32 %v506_v56 }
 0x25a   :  { %530 = vadd.xlane.f32.xlu1 %v529_v40  ;;  %v465_v55 = vpop.xlane.xlu1 %464  ;;  %v3632_v61 = vpop.eup %3154 }
 0x25b   :  { %527 = vadd.xlane.f32.xlu0 %v526_v60  ;;  %v532_v4 = vsel %vm63_vm0, %v3632_v61, 0.0  ;;  %v481_v22 = vsub.f32 %v3582_v57, %v465_v55  ;;  %v510_v63 = vmul.f32 1.442695, %v480_v16  ;;  %3168 = vpow2.f32 %v508_v20 }
 0x25c   :  { %v3634_v62 = vpop.eup %3156  ;;  %v601_v0 = vpop.permute.xlu0 %600 }
 0x25d   :  { %2927 = vmatprep.subr.mxu0 %v601_v0  ;;  %v535_v2 = vsel %vm63_vm0, %v3634_v62, 0.0  ;;  %v512_v59 = vmul.f32 1.442695, %v481_v22  ;;  %3170 = vpow2.f32 %v510_v63  ;;  %v850_v63 = vld [vmem:[%s4231_s3 + $0x38] sm:$0xff] }
 0x25e   :  { %536 = vadd.xlane.f32.xlu1 %v535_v2  ;;  %v599_v3 = vpop.permute.xlu1 %598  ;;  %2928 = vmatpush3.msra.mxu0 %v601_v0  ;;  %v3640_v5 = vpop.eup %3158 }
 0x25f   :  { %533 = vadd.xlane.f32.xlu0 %v532_v4  ;;  %2929 = vmatprep.subr.mxu0 %v599_v3  ;;  %v538_v10 = vsel %vm63_vm0, %v3640_v5, 0.0  ;;  %3172 = vpow2.f32 %v512_v59  ;;  %v849_v59 = vld [vmem:[%s4231_s3 + $0x30] sm:$0xff] }
 0x260   :  { %v3642_v6 = vpop.eup %3160  ;;  %2930 = vmatpush3.msra.mxu0 %v599_v3 }
 0x261   :  { %v541_v7 = vsel %vm63_vm0, %v3642_v6, 0.0 }
 0x262   :  { %542 = vadd.xlane.f32.xlu1 %v541_v7  ;;  %v3648_v11 = vpop.eup %3162 }
 0x263   :  { %539 = vadd.xlane.f32.xlu0 %v538_v10  ;;  %v544_v13 = vsel %vm63_vm0, %v3648_v11, 0.0 }
 0x264   :  { %v3650_v12 = vpop.eup %3164 }
 0x265   :  { %v547_v33 = vsel %vm63_vm0, %v3650_v12, 0.0 }
 0x266   :  { %548 = vadd.xlane.f32.xlu1 %v547_v33 }
 0x267   :  { %545 = vadd.xlane.f32.xlu0 %v544_v13 }
 0x277   :  { %594 = vrot.lane.b32.xlu1 %v3424_v27, %s3325_s2  ;;  %v3664_v27 = vpop.eup %3166 }
 0x278   :  { %v3666_v24 = vpop.eup %3168 }
 0x279   :  { %v3670_v48 = vpop.eup %3170  ;;  %v553_v49 = vsel %vm63_vm0, %v3666_v24, 0.0 }
 0x27a   :  { %v3674_v57 = vpop.eup %3172  ;;  %v556_v58 = vsel %vm63_vm0, %v3670_v48, 0.0 }
 0x27b   :  { %v559_v25 = vsel %vm63_vm0, %v3674_v57, 0.0 }
 0x27d   :  { %596 = vrot.lane.b32.xlu0 %v3438_v34, %s3325_s2  ;;  %v550_v34 = vsel %vm63_vm0, %v3664_v27, 0.0 }
 0x29b   :  { %551 = vadd.xlane.f32.xlu1 %v550_v34 }
 0x29c   :  { %554 = vadd.xlane.f32.xlu0 %v553_v49 }
 0x29f   :  { %557 = vadd.xlane.f32.xlu1 %v556_v58 }
 0x2a0   :  { %560 = vadd.xlane.f32.xlu0 %v559_v25 }
 0x2d7   :  { %v519_v1 = vpop.xlane.xlu1 %518 }
 0x2db   :  { %v525_v32 = vpop.xlane.xlu1 %524 }
 0x2dc   :  { %v516_v28 = vpop.xlane.xlu0 %515 }
 0x2dd   :  { %3174 = vrcp.f32 %v516_v28 }
 0x2de   :  { %3176 = vrcp.f32 %v519_v1 }
 0x2e0   :  { %v522_v9 = vpop.xlane.xlu0 %521 }
 0x2e1   :  { %3178 = vrcp.f32 %v522_v9 }
 0x2e2   :  { %3180 = vrcp.f32 %v525_v32 }
 0x2e3   :  { %v531_v35 = vpop.xlane.xlu1 %530 }
 0x2e4   :  { %v528_v8 = vpop.xlane.xlu0 %527 }
 0x2e5   :  { %3182 = vrcp.f32 %v528_v8  ;;  %v2641_v8 = vld [vmem:[#allocation2 + $0x5] ss:$0 sm:$0xff] }
 0x2e6   :  { %3184 = vrcp.f32 %v531_v35 }
 0x2e7   :  { %v537_v18 = vpop.xlane.xlu1 %536 }
 0x2e8   :  { %v534_v36 = vpop.xlane.xlu0 %533 }
 0x2e9   :  { %3186 = vrcp.f32 %v534_v36 }
 0x2ea   :  { %v3175_v38 = vpop.eup %3174  ;;  %3188 = vrcp.f32 %v537_v18  ;;  %v2640_v18 = vld [vmem:[#allocation2 + $0x4] ss:$0 sm:$0xff] }
 0x2eb   :  { %v543_v39 = vpop.xlane.xlu1 %542  ;;  %v578_v42 = vmul.f32 %v3175_v38, %v3612_v17  ;;  %v3177_v45 = vpop.eup %3176  ;;  %v2642_v38 = vld [vmem:[#allocation2 + $0x6] ss:$0 sm:$0xff] }
 0x2ec   :  { %v540_v31 = vpop.xlane.xlu0 %539  ;;  %v579_v17 = vmul.f32 %v3177_v45, %v3604_v26 }
 0x2ed   :  { %2935 = vmatprep.mubr.msk.f32.mxu0 %vm63_vm0, %v578_v42  ;;  %3190 = vrcp.f32 %v540_v31 }
 0x2ee   :  { %v3179_v47 = vpop.eup %3178  ;;  %3192 = vrcp.f32 %v543_v39 }
 0x2ef   :  { %v549_v43 = vpop.xlane.xlu1 %548  ;;  %v3181_v41 = vpop.eup %3180  ;;  %v580_v51 = vmul.f32 %v3179_v47, %v3620_v46 }
 0x2f0   :  { %v546_v44 = vpop.xlane.xlu0 %545  ;;  %v581_v40 = vmul.f32 %v3181_v41, %v3610_v37 }
 0x2f1   :  { %3194 = vrcp.f32 %v546_v44  ;;  %v2643_v44 = vld [vmem:[#allocation2 + $0x7] ss:$0 sm:$0xff] }
 0x2f2   :  { %v3183_v54 = vpop.eup %3182  ;;  %3196 = vrcp.f32 %v549_v43 }
 0x2f3   :  { %v595_v50 = vpop.permute.xlu1 %594  ;;  %v3185_v55 = vpop.eup %3184  ;;  %v582_v60 = vmul.f32 %v3183_v54, %v3624_v52 }
 0x2f4   :  { %v597_v29 = vpop.permute.xlu0 %596  ;;  %v583_v26 = vmul.f32 %v3185_v55, %v3626_v53 }
 0x2f5   :  { %2931 = vmatprep.subr.mxu0 %v597_v29 }
 0x2f6   :  { %2932 = vmatpush3.msra.mxu0 %v597_v29  ;;  %v3187_v0 = vpop.eup %3186 }
 0x2f7   :  { %2933 = vmatprep.subr.mxu0 %v595_v50  ;;  %v3189_v2 = vpop.eup %3188  ;;  %v584_v46 = vmul.f32 %v3187_v0, %v3632_v61 }
 0x2f8   :  { %2934 = vmatpush3.msra.mxu0 %v595_v50  ;;  %v585_v37 = vmul.f32 %v3189_v2, %v3634_v62 }
 0x2f9   :  { %2936 = vmatmul.mubr.msk.f32.vlgmr.msra.gmra.mxu0 %vm63_vm0, %v579_v17  ;;  %2959 = vmatprep.subr.mxu0 %v850_v63 }
 0x2fa   :  { %2938 = vmatprep.mubr.msk.f32.mxu0 %vm63_vm0, %v580_v51  ;;  %v3191_v3 = vpop.eup %3190  ;;  %2960 = vmatpush3.msra.mxu0 %v850_v63 }
 0x2fb   :  { %v3193_v4 = vpop.eup %3192  ;;  %v586_v52 = vmul.f32 %v3191_v3, %v3640_v5  ;;  %2961 = vmatprep.subr.mxu0 %v849_v59 }
 0x2fc   :  { %v587_v53 = vmul.f32 %v3193_v4, %v3642_v6  ;;  %2962 = vmatpush3.msra.mxu0 %v849_v59 }
 0x2fd   :  { %2939 = vmatmul.mubr.msk.f32.gmra.mxu0 %vm63_vm0, %v581_v40 }
 0x2fe   :  { %2941 = vmatprep.mubr.msk.f32.mxu0 %vm63_vm0, %v582_v60  ;;  %v3195_v7 = vpop.eup %3194 }
 0x2ff   :  { %v3197_v10 = vpop.eup %3196  ;;  %v588_v61 = vmul.f32 %v3195_v7, %v3648_v11 }
 0x300   :  { %v589_v33 = vmul.f32 %v3197_v10, %v3650_v12 }
 0x301   :  { %2942 = vmatmul.mubr.msk.f32.gmra.mxu0 %vm63_vm0, %v583_v26 }
 0x302   :  { %2944 = vmatprep.mubr.msk.f32.mxu0 %vm63_vm0, %v584_v46 }
 0x305   :  { %2945 = vmatmul.mubr.msk.f32.gmra.mxu0 %vm63_vm0, %v585_v37 }
 0x306   :  { %2947 = vmatprep.mubr.msk.f32.mxu0 %vm63_vm0, %v586_v52 }
 0x309   :  { %2948 = vmatmul.mubr.msk.f32.gmra.mxu0 %vm63_vm0, %v587_v53 }
 0x30a   :  { %2950 = vmatprep.mubr.msk.f32.mxu0 %vm63_vm0, %v588_v61 }
 0x30d   :  { %2951 = vmatmul.mubr.msk.f32.gmra.mxu0 %vm63_vm0, %v589_v33 }
 0x324   :  { %v552_v62 = vpop.xlane.xlu1 %551 }
 0x325   :  { %3198 = vrcp.f32 %v552_v62  ;;  %v555_v5 = vpop.xlane.xlu0 %554 }
 0x326   :  { %3200 = vrcp.f32 %v555_v5 }
 0x328   :  { %v558_v13 = vpop.xlane.xlu1 %557 }
 0x329   :  { %3202 = vrcp.f32 %v558_v13  ;;  %v561_v30 = vpop.xlane.xlu0 %560 }
 0x32a   :  { %3204 = vrcp.f32 %v561_v30 }
 0x332   :  { %v3199_v6 = vpop.eup %3198 }
 0x333   :  { %v3201_v15 = vpop.eup %3200  ;;  %v590_v11 = vmul.f32 %v3199_v6, %v3664_v27  ;;  %v848_v27 = vld [vmem:[%s4231_s3 + $0x28] sm:$0xff] }
 0x334   :  { %v591_v56 = vmul.f32 %v3201_v15, %v3666_v24  ;;  %v847_v24 = vld [vmem:[%s4231_s3 + $0x20] sm:$0xff]  ;;  %2963 = vmatprep.subr.mxu0 %v848_v27  ;;  %v2644_v6 = vld [vmem:[#allocation2 + $0xb] ss:$0 sm:$0xff] }
 0x335   :  { %2953 = vmatprep.mubr.msk.f32.mxu0 %vm63_vm0, %v590_v11  ;;  %2964 = vmatpush3.msra.mxu0 %v848_v27 }
 0x336   :  { %v3203_v16 = vpop.eup %3202  ;;  %2954 = vmatmul.mubr.msk.f32.gmra.mxu0 %vm63_vm0, %v591_v56  ;;  %2965 = vmatprep.subr.mxu0 %v847_v24 }
 0x337   :  { %v3205_v12 = vpop.eup %3204  ;;  %v592_v20 = vmul.f32 %v3203_v16, %v3670_v48  ;;  %2966 = vmatpush3.msra.mxu0 %v847_v24 }
 0x338   :  { %v593_v22 = vmul.f32 %v3205_v12, %v3674_v57 }
 0x339   :  { %2956 = vmatprep.mubr.msk.f32.mxu0 %vm63_vm0, %v592_v20 }
 0x33a   :  { %2957 = vmatmul.mubr.msk.f32.gmra.mxu0 %vm63_vm0, %v593_v22 }
 0x3b9   :  { %v2937_v34 = vpop.f32.mrf.mxu0 }
 0x3ba   :  { %v805_v45 = vmul.f32 %v2937_v34, %v2640_v18 }
 0x3bb   :  { %v720_v48 = vpop.f32.mrf.mxu0 }
 0x3bc   :  { %v804_v31 = vmul.f32 %v2640_v18, %v720_v48 }
 0x3bd   :  { %v2940_v49 = vpop.f32.mrf.mxu0 }
 0x3be   :  { %v807_v2 = vmul.f32 %v2940_v49, %v2640_v18 }
 0x3bf   :  { %v730_v57 = vpop.f32.mrf.mxu0 }
 0x3c0   :  { %v806_v55 = vmul.f32 %v2640_v18, %v730_v57 }
 0x3c1   :  { %v2943_v58 = vpop.f32.mrf.mxu0 }
 0x3c2   :  { %v814_v39 = vmul.f32 %v2943_v58, %v2641_v8 }
 0x3c3   :  { %v740_v25 = vpop.f32.mrf.mxu0 }
 0x3c4   :  { %v813_v36 = vmul.f32 %v2641_v8, %v740_v25  ;;  %v818_v41 = vadd.f32 %v814_v39, %v805_v45 }
 0x3c5   :  { %v2946_v1 = vpop.f32.mrf.mxu0 }
 0x3c6   :  { %v817_v50 = vadd.f32 %v813_v36, %v804_v31  ;;  %v816_v51 = vmul.f32 %v2946_v1, %v2641_v8 }
 0x3c7   :  { %v750_v28 = vpop.f32.mrf.mxu0 }
 0x3c8   :  { %v815_v17 = vmul.f32 %v2641_v8, %v750_v28  ;;  %v820_v7 = vadd.f32 %v816_v51, %v807_v2 }
 0x3c9   :  { %v2949_v32 = vpop.f32.mrf.mxu0 }
 0x3ca   :  { %v827_v29 = vmul.f32 %v2949_v32, %v2642_v38  ;;  %v819_v4 = vadd.f32 %v815_v17, %v806_v55  ;;  %v1028_v17 = vld [vmem:[%s4231_s3 + $0x40] sm:$0xff] }
 0x3cb   :  { %v760_v9 = vpop.f32.mrf.mxu0 }
 0x3cc   :  { %v826_v43 = vmul.f32 %v2642_v38, %v760_v9  ;;  %v831_v46 = vadd.f32 %v827_v29, %v818_v41 }
 0x3cd   :  { %v2952_v35 = vpop.f32.mrf.mxu0 }
 0x3ce   :  { %v830_v60 = vadd.f32 %v826_v43, %v817_v50  ;;  %v829_v3 = vmul.f32 %v2952_v35, %v2642_v38  ;;  %v1029_v50 = vld [vmem:[%s4231_s3 + $0x48] sm:$0xff] }
 0x3cf   :  { %v770_v42 = vpop.f32.mrf.mxu0 }
 0x3d0   :  { %v828_v0 = vmul.f32 %v2642_v38, %v770_v42  ;;  %v833_v5 = vadd.f32 %v829_v3, %v820_v7  ;;  %v2649_v7 = vld [vmem:[#allocation2 + $0xc] ss:$0 sm:$0xff] }
 0x3d2   :  { %v832_v33 = vadd.f32 %v828_v0, %v819_v4 }
 0x3f6   :  { %v2955_v47 = vpop.f32.mrf.mxu0 }
 0x3f7   :  { %v840_v54 = vmul.f32 %v2955_v47, %v2643_v44  ;;  %v1030_v47 = vld [vmem:[%s4231_s3 + $0x50] sm:$0xff] }
 0x3f8   :  { %v780_v40 = vpop.f32.mrf.mxu0 }
 0x3f9   :  { %v839_v26 = vmul.f32 %v2643_v44, %v780_v40  ;;  %v844_v53 = vadd.f32 %v840_v54, %v831_v46 }
 0x3fa   :  { %v2958_v37 = vpop.f32.mrf.mxu0 }
 0x3fb   :  { %v843_v52 = vadd.f32 %v839_v26, %v830_v60  ;;  %v842_v10 = vmul.f32 %v2958_v37, %v2643_v44 }
 0x3fc   :  { %v790_v61 = vpop.f32.mrf.mxu0 }
 0x3fd   :  { %v841_v62 = vmul.f32 %v2643_v44, %v790_v61  ;;  %2967 = vmatprep.mubr.msk.f32.mxu0 %vm63_vm0, %v843_v52  ;;  %v846_v30 = vadd.f32 %v842_v10, %v833_v5 }
 0x3fe   :  { %2968 = vmatmul.mubr.msk.f32.vlgmr.msra.gmra.mxu0 %vm63_vm0, %v844_v53 }
 0x3ff   :  { %v845_v13 = vadd.f32 %v841_v62, %v832_v33  ;;  %v2650_v62 = vld [vmem:[#allocation2 + $0xd] ss:$0 sm:$0xff] }
 0x401   :  { %2970 = vmatprep.mubr.msk.f32.mxu0 %vm63_vm0, %v845_v13 }
 0x402   :  { %2971 = vmatmul.mubr.msk.f32.gmra.mxu0 %vm63_vm0, %v846_v30 }
 0x4be   :  { %v2969_v15 = vpop.f32.mrf.mxu0 }
 0x4bf   :  { %v940_v11 = vadd.f32 %v2969_v15, %v2644_v6 }
 0x4c0   :  { %v934_v56 = vpop.f32.mrf.mxu0 }
 0x4c1   :  { %v3729_v16 = vadd.f32 %v940_v11, %v3407_v19  ;;  %v935_v12 = vadd.f32 %v2644_v6, %v934_v56 }
 0x4c2   :  { %v2972_v20 = vpop.f32.mrf.mxu0 }
 0x4c3   :  { %v3732_v22 = vadd.f32 %v935_v12, %v3396_v14  ;;  %v950_v63 = vadd.f32 %v2972_v20, %v2644_v6  ;;  %v962_v59 = vsel %vm63_vm0, %v3729_v16, 0.0 }
 0x4c4   :  { %963 = vadd.xlane.f32.xlu1 %v962_v59  ;;  %v944_v27 = vpop.f32.mrf.mxu0  ;;  %v1165_v59 = vld [vmem:[%s4231_s3 + $0x98] sm:$0xff] }
 0x4c5   :  { %v3737_v24 = vadd.f32 %v950_v63, %v3418_v23  ;;  %v945_v34 = vadd.f32 %v2644_v6, %v944_v27  ;;  %v959_v48 = vsel %vm63_vm0, %v3732_v22, 0.0  ;;  %v1031_v23 = vld [vmem:[%s4231_s3 + $0x58] sm:$0xff]  ;;  %v1164_v27 = vld [vmem:[%s4231_s3 + $0x90] sm:$0xff]  ;;  %2987 = vmatprep.subr.mxu0 %v1165_v59 }
 0x4c6   :  { %960 = vadd.xlane.f32.xlu0 %v959_v48  ;;  %2973 = vmatprep.subr.mxu1 %v1031_v23  ;;  %v1162_v48 = vld [vmem:[%s4231_s3 + $0x80] sm:$0xff] }
 0x4c7   :  { %v3742_v19 = vadd.f32 %v945_v34, %v3411_v21  ;;  %v968_v14 = vsel %vm63_vm0, %v3737_v24, 0.0  ;;  %2974 = vmatpush3.msra.mxu1 %v1031_v23  ;;  %2988 = vmatpush3.msra.mxu0 %v1165_v59  ;;  %v1163_v34 = vld [vmem:[%s4231_s3 + $0x88] sm:$0xff] }
 0x4c8   :  { %969 = vadd.xlane.f32.xlu1 %v968_v14  ;;  %2975 = vmatprep.subr.mxu1 %v1030_v47  ;;  %v1161_v14 = vld [vmem:[%s4231_s3 + $0x78] sm:$0xff]  ;;  %v1159_v23 = vld [vmem:[%s4231_s3 + $0x68] sm:$0xff] }
 0x4c9   :  { %v965_v49 = vsel %vm63_vm0, %v3742_v19, 0.0  ;;  %2976 = vmatpush3.msra.mxu1 %v1030_v47  ;;  %2989 = vmatprep.subr.mxu0 %v1164_v27 }
 0x4ca   :  { %966 = vadd.xlane.f32.xlu0 %v965_v49  ;;  %2977 = vmatprep.subr.mxu1 %v1029_v50  ;;  %v1160_v49 = vld [vmem:[%s4231_s3 + $0x70] sm:$0xff] }
 0x4cb   :  { %2978 = vmatpush3.msra.mxu1 %v1029_v50  ;;  %2990 = vmatpush3.msra.mxu0 %v1164_v27 }
 0x4cc   :  { %2979 = vmatprep.subr.mxu1 %v1028_v17  ;;  %2991 = vmatprep.subr.mxu0 %v1163_v34 }
 0x4cd   :  { %2980 = vmatpush3.msra.mxu1 %v1028_v17  ;;  %2992 = vmatpush3.msra.mxu0 %v1163_v34  ;;  %v1350_v34 = vld [vmem:[%s4231_s3 + $0xb8] sm:$0xff] }
 0x4ce   :  { %2993 = vmatprep.subr.mxu0 %v1162_v48  ;;  %3009 = vmatprep.subr.mxu1 %v1350_v34 }
 0x4cf   :  { %2994 = vmatpush3.msra.mxu0 %v1162_v48  ;;  %v1349_v48 = vld [vmem:[%s4231_s3 + $0xb0] sm:$0xff] }
 0x4d0   :  { %2995 = vmatprep.subr.mxu0 %v1161_v14 }
 0x4d1   :  { %2996 = vmatpush3.msra.mxu0 %v1161_v14  ;;  %v1348_v14 = vld [vmem:[%s4231_s3 + $0xa8] sm:$0xff] }
 0x4d2   :  { %2997 = vmatprep.subr.mxu0 %v1160_v49 }
 0x4d3   :  { %2998 = vmatpush3.msra.mxu0 %v1160_v49  ;;  %v1347_v49 = vld [vmem:[%s4231_s3 + $0xa0] sm:$0xff] }
 0x4d4   :  { %2999 = vmatprep.subr.mxu0 %v1159_v23 }
 0x4d5   :  { %3000 = vmatpush3.msra.mxu0 %v1159_v23 }
 0x54d   :  { %v964_v57 = vpop.xlane.xlu1 %963 }
 0x54e   :  { %v973_v58 = vmul.f32 0.03125, %v964_v57  ;;  %v1158_v57 = vld [vmem:[%s4231_s3 + $0x60] sm:$0xff] }
 0x54f   :  { %v961_v25 = vpop.xlane.xlu0 %960  ;;  %3001 = vmatprep.subr.mxu0 %v1158_v57 }
 0x550   :  { %v977_v21 = vsub.f32 %v3729_v16, %v973_v58  ;;  %v972_v1 = vmul.f32 0.03125, %v961_v25  ;;  %3002 = vmatpush3.msra.mxu0 %v1158_v57  ;;  %v2651_v58 = vld [vmem:[#allocation2 + $0xe] ss:$0 sm:$0xff] }
 0x551   :  { %v970_v28 = vpop.xlane.xlu1 %969 }
 0x552   :  { %v976_v32 = vsub.f32 %v3732_v22, %v972_v1  ;;  %v975_v9 = vmul.f32 0.03125, %v970_v28  ;;  %v981_v35 = vmul.f32 %v977_v21, %v977_v21 }
 0x553   :  { %v967_v8 = vpop.xlane.xlu0 %966 }
 0x554   :  { %v979_v18 = vsub.f32 %v3737_v24, %v975_v9  ;;  %v974_v36 = vmul.f32 0.03125, %v967_v8  ;;  %v987_v38 = vsel %vm63_vm0, %v981_v35, 0.0  ;;  %v980_v39 = vmul.f32 %v976_v32, %v976_v32 }
 0x555   :  { %988 = vadd.xlane.f32.xlu1 %v987_v38 }
 0x556   :  { %v978_v42 = vsub.f32 %v3742_v19, %v974_v36  ;;  %v984_v31 = vsel %vm63_vm0, %v980_v39, 0.0  ;;  %v983_v43 = vmul.f32 %v979_v18, %v979_v18 }
 0x557   :  { %985 = vadd.xlane.f32.xlu0 %v984_v31 }
 0x558   :  { %v993_v44 = vsel %vm63_vm0, %v983_v43, 0.0  ;;  %v982_v45 = vmul.f32 %v978_v42, %v978_v42 }
 0x559   :  { %994 = vadd.xlane.f32.xlu1 %v993_v44 }
 0x55a   :  { %v990_v29 = vsel %vm63_vm0, %v982_v45, 0.0 }
 0x55b   :  { %991 = vadd.xlane.f32.xlu0 %v990_v29 }
 0x5de   :  { %v989_v41 = vpop.xlane.xlu1 %988 }
 0x5df   :  { %v997_v51 = vmul.f32 0.03125, %v989_v41  ;;  %v2660_v41 = vld [vmem:[#allocation2 + $0xf] ss:$0 sm:$0xff] }
 0x5e0   :  { %v986_v54 = vpop.xlane.xlu0 %985 }
 0x5e1   :  { %v1001_v40 = vadd.f32 1e-05, %v997_v51  ;;  %v996_v55 = vmul.f32 0.03125, %v986_v54 }
 0x5e2   :  { %v995_v60 = vpop.xlane.xlu1 %994 }
 0x5e3   :  { %3206 = vrsqrt.f32 %v1001_v40  ;;  %v1000_v0 = vadd.f32 1e-05, %v996_v55  ;;  %v999_v26 = vmul.f32 0.03125, %v995_v60 }
 0x5e4   :  { %v992_v2 = vpop.xlane.xlu0 %991 }
 0x5e5   :  { %3208 = vrsqrt.f32 %v1000_v0  ;;  %v1003_v46 = vadd.f32 1e-05, %v999_v26  ;;  %v998_v3 = vmul.f32 0.03125, %v992_v2 }
 0x5e7   :  { %3210 = vrsqrt.f32 %v1003_v46  ;;  %v1002_v37 = vadd.f32 1e-05, %v998_v3 }
 0x5e9   :  { %3212 = vrsqrt.f32 %v1002_v37 }
 0x5f0   :  { %v3207_v4 = vpop.eup %3206 }
 0x5f1   :  { %v1009_v52 = vmul.f32 %v3207_v4, %v977_v21 }
 0x5f2   :  { %v3209_v53 = vpop.eup %3208 }
 0x5f3   :  { %v1008_v10 = vmul.f32 %v3209_v53, %v976_v32  ;;  %v1017_v33 = vmul.f32 %v2649_v7, %v1009_v52 }
 0x5f4   :  { %v3211_v61 = vpop.eup %3210 }
 0x5f5   :  { %v1016_v5 = vmul.f32 %v2649_v7, %v1008_v10  ;;  %v1011_v13 = vmul.f32 %v3211_v61, %v979_v18  ;;  %v1025_v11 = vadd.f32 %v2650_v62, %v1017_v33 }
 0x5f6   :  { %v3213_v30 = vpop.eup %3212 }
 0x5f7   :  { %v1024_v6 = vadd.f32 %v2650_v62, %v1016_v5  ;;  %v1010_v15 = vmul.f32 %v3213_v30, %v978_v42  ;;  %v1019_v56 = vmul.f32 %v2649_v7, %v1011_v13 }
 0x5f9   :  { %2981 = vmatprep.mubr.msk.f32.mxu1 %vm63_vm0, %v1024_v6  ;;  %v1018_v12 = vmul.f32 %v2649_v7, %v1010_v15  ;;  %v1027_v63 = vadd.f32 %v2650_v62, %v1019_v56 }
 0x5fa   :  { %2982 = vmatmul.mubr.msk.f32.vlgmr.msra.gmra.mxu1 %vm63_vm0, %v1025_v11 }
 0x5fb   :  { %v1026_v20 = vadd.f32 %v2650_v62, %v1018_v12  ;;  %3010 = vmatpush3.msra.mxu1 %v1350_v34 }
 0x5fc   :  { %3011 = vmatprep.subr.mxu1 %v1349_v48 }
 0x5fd   :  { %2984 = vmatprep.mubr.msk.f32.mxu1 %vm63_vm0, %v1026_v20  ;;  %3012 = vmatpush3.msra.mxu1 %v1349_v48 }
 0x5fe   :  { %2985 = vmatmul.mubr.msk.f32.gmra.mxu1 %vm63_vm0, %v1027_v63  ;;  %3013 = vmatprep.subr.mxu1 %v1348_v14 }
 0x5ff   :  { %3014 = vmatpush3.msra.mxu1 %v1348_v14 }
 0x600   :  { %3015 = vmatprep.subr.mxu1 %v1347_v49 }
 0x601   :  { %3016 = vmatpush3.msra.mxu1 %v1347_v49  ;;  %v1490_v49 = vld [vmem:[%s4232_s4 + $0x88] sm:$0xff] }
 0x6ba   :  { %v2983_v25 = vpop.f32.mrf.mxu1 }
 0x6bb   :  { %v1121_v21 = vadd.f32 %v2983_v25, %v2651_v58 }
 0x6bc   :  { %v1115_v1 = vpop.f32.mrf.mxu1 }
 0x6bd   :  { %v1135_v28 = vmax.f32 %v1121_v21, 0.0  ;;  %v1116_v32 = vadd.f32 %v2651_v58, %v1115_v1 }
 0x6be   :  { %v2986_v9 = vpop.f32.mrf.mxu1 }
 0x6bf   :  { %v1134_v35 = vmax.f32 %v1116_v32, 0.0  ;;  %1144 = vrot.lane.b32.xlu1 %v1135_v28, %s3326_s13  ;;  %v1131_v36 = vadd.f32 %v2986_v9, %v2651_v58 }
 0x6c0   :  { %v1125_v8 = vpop.f32.mrf.mxu1 }
 0x6c1   :  { %v1126_v18 = vadd.f32 %v2651_v58, %v1125_v8  ;;  %1142 = vrot.lane.b32.xlu0 %v1134_v35, %s3326_s13  ;;  %v1137_v39 = vmax.f32 %v1131_v36, 0.0 }
 0x6c3   :  { %v1136_v38 = vmax.f32 %v1126_v18, 0.0 }
 0x6c5   :  { %1146 = vrot.lane.b32.xlu1 %v1136_v38, %s3326_s13 }
 0x6c9   :  { %1148 = vrot.lane.b32.xlu1 %v1137_v39, %s3326_s13  ;;  %v2661_v39 = vld [vmem:[#allocation2 + $0x14] ss:$0 sm:$0xff] }
 0x731   :  { %v1145_v42 = vpop.permute.xlu1 %1144 }
 0x732   :  { %v1155_v44 = vmul.f32 %v1145_v42, %v1121_v21 }
 0x733   :  { %v1143_v31 = vpop.permute.xlu0 %1142 }
 0x734   :  { %v1154_v43 = vmul.f32 %v1143_v31, %v1116_v32 }
 0x736   :  { %3003 = vmatprep.mubr.msk.f32.mxu0 %vm1166_vm1, %v1154_v43 }
 0x737   :  { %v1147_v45 = vpop.permute.xlu1 %1146  ;;  %3004 = vmatmul.mubr.msk.f32.vlgmr.msra.gmra.mxu0 %vm1166_vm1, %v1155_v44  ;;  %v2662_v44 = vld [vmem:[#allocation2 + $0x15] ss:$0 sm:$0xff] }
 0x738   :  { %v1156_v29 = vmul.f32 %v1147_v45, %v1126_v18 }
 0x73a   :  { %3006 = vmatprep.mubr.msk.f32.mxu0 %vm1166_vm1, %v1156_v29 }
 0x73b   :  { %v1149_v47 = vpop.permute.xlu1 %1148 }
 0x73c   :  { %v1157_v50 = vmul.f32 %v1149_v47, %v1131_v36 }
 0x73e   :  { %3007 = vmatmul.mubr.msk.f32.gmra.mxu0 %vm1166_vm1, %v1157_v50 }
 0x7f7   :  { %v3005_v17 = vpop.f32.mrf.mxu0 }
 0x7f8   :  { %v1265_v51 = vadd.f32 %v3005_v17, %v3729_v16 }
 0x7f9   :  { %v1245_v54 = vpop.f32.mrf.mxu0 }
 0x7fa   :  { %v3805_v40 = vadd.f32 %v2660_v41, %v1265_v51  ;;  %v1264_v55 = vadd.f32 %v1245_v54, %v3732_v22 }
 0x7fc   :  { %v3808_v60 = vadd.f32 %v2660_v41, %v1264_v55  ;;  %v1282_v0 = vsel %vm63_vm0, %v3805_v40, 0.0 }
 0x7fd   :  { %1283 = vadd.xlane.f32.xlu1 %v1282_v0 }
 0x7fe   :  { %v3008_v26 = vpop.f32.mrf.mxu0  ;;  %v1279_v2 = vsel %vm63_vm0, %v3808_v60, 0.0 }
 0x7ff   :  { %1280 = vadd.xlane.f32.xlu0 %v1279_v2  ;;  %v1267_v3 = vadd.f32 %v3008_v26, %v3737_v24 }
 0x800   :  { %v1255_v46 = vpop.f32.mrf.mxu0 }
 0x801   :  { %v1266_v16 = vadd.f32 %v1255_v46, %v3742_v19  ;;  %v3818_v4 = vadd.f32 %v2660_v41, %v1267_v3  ;;  %v2663_v46 = vld [vmem:[#allocation2 + $0x16] ss:$0 sm:$0xff] }
 0x803   :  { %v3816_v37 = vadd.f32 %v2660_v41, %v1266_v16  ;;  %v1288_v52 = vsel %vm63_vm0, %v3818_v4, 0.0 }
 0x805   :  { %v1285_v22 = vsel %vm63_vm0, %v3816_v37, 0.0 }
 0x806   :  { %1286 = vadd.xlane.f32.xlu0 %v1285_v22  ;;  %v2668_v22 = vld [vmem:[#allocation2 + $0x1c] ss:$0 sm:$0xff] }
 0x80a   :  { %1289 = vadd.xlane.f32.xlu0 %v1288_v52 }
 0x886   :  { %v1284_v7 = vpop.xlane.xlu1 %1283 }
 0x887   :  { %v1292_v53 = vmul.f32 0.03125, %v1284_v7 }
 0x888   :  { %v1281_v10 = vpop.xlane.xlu0 %1280 }
 0x889   :  { %v1296_v61 = vsub.f32 %v3805_v40, %v1292_v53  ;;  %v1291_v24 = vmul.f32 0.03125, %v1281_v10 }
 0x88b   :  { %v1295_v19 = vsub.f32 %v3808_v60, %v1291_v24  ;;  %v1300_v33 = vmul.f32 %v1296_v61, %v1296_v61 }
 0x88d   :  { %v1306_v62 = vsel %vm63_vm0, %v1300_v33, 0.0  ;;  %v1299_v5 = vmul.f32 %v1295_v19, %v1295_v19 }
 0x88e   :  { %1307 = vadd.xlane.f32.xlu1 %v1306_v62 }
 0x88f   :  { %v1287_v13 = vpop.xlane.xlu0 %1286  ;;  %v1303_v30 = vsel %vm63_vm0, %v1299_v5, 0.0  ;;  %v2669_v5 = vld [vmem:[#allocation2 + $0x1d] ss:$0 sm:$0xff] }
 0x890   :  { %v1293_v6 = vmul.f32 0.03125, %v1287_v13  ;;  %1304 = vadd.xlane.f32.xlu0 %v1303_v30 }
 0x892   :  { %v1297_v15 = vsub.f32 %v3816_v37, %v1293_v6 }
 0x893   :  { %v1290_v11 = vpop.xlane.xlu0 %1289 }
 0x894   :  { %v1294_v56 = vmul.f32 0.03125, %v1290_v11  ;;  %v1301_v12 = vmul.f32 %v1297_v15, %v1297_v15  ;;  %v2670_v11 = vld [vmem:[#allocation2 + $0x1e] ss:$0 sm:$0xff] }
 0x896   :  { %v1298_v20 = vsub.f32 %v3818_v4, %v1294_v56  ;;  %v1309_v63 = vsel %vm63_vm0, %v1301_v12, 0.0 }
 0x897   :  { %1310 = vadd.xlane.f32.xlu0 %v1309_v63 }
 0x898   :  { %v1302_v59 = vmul.f32 %v1298_v20, %v1298_v20 }
 0x89a   :  { %v1312_v27 = vsel %vm63_vm0, %v1302_v59, 0.0  ;;  %v2671_v59 = vld [vmem:[#allocation2 + $0x1f] ss:$0 sm:$0xff] }
 0x89b   :  { %1313 = vadd.xlane.f32.xlu1 %v1312_v27 }
 0x917   :  { %v1308_v23 = vpop.xlane.xlu1 %1307 }
 0x918   :  { %v1316_v57 = vmul.f32 0.03125, %v1308_v23 }
 0x919   :  { %v1305_v58 = vpop.xlane.xlu0 %1304 }
 0x91a   :  { %v1320_v25 = vadd.f32 1e-05, %v1316_v57  ;;  %v1315_v21 = vmul.f32 0.03125, %v1305_v58  ;;  %v1489_v57 = vld [vmem:[%s4232_s4 + $0x80] sm:$0xff] }
 0x91c   :  { %3214 = vrsqrt.f32 %v1320_v25  ;;  %v1319_v1 = vadd.f32 1e-05, %v1315_v21  ;;  %v1492_v21 = vld [vmem:[%s4232_s4 + $0x98] sm:$0xff] }
 0x91e   :  { %3216 = vrsqrt.f32 %v1319_v1 }
 0x920   :  { %v1311_v28 = vpop.xlane.xlu0 %1310 }
 0x921   :  { %v1317_v32 = vmul.f32 0.03125, %v1311_v28 }
 0x923   :  { %v1321_v9 = vadd.f32 1e-05, %v1317_v32 }
 0x924   :  { %v1314_v35 = vpop.xlane.xlu1 %1313 }
 0x925   :  { %3218 = vrsqrt.f32 %v1321_v9  ;;  %v1318_v8 = vmul.f32 0.03125, %v1314_v35  ;;  %v1491_v9 = vld [vmem:[%s4232_s4 + $0x90] sm:$0xff] }
 0x927   :  { %v1322_v18 = vadd.f32 1e-05, %v1318_v8 }
 0x929   :  { %v3215_v36 = vpop.eup %3214  ;;  %3220 = vrsqrt.f32 %v1322_v18 }
 0x92a   :  { %v1328_v38 = vmul.f32 %v3215_v36, %v1296_v61  ;;  %v1494_v36 = vld [vmem:[%s4232_s4 + $0xa8] sm:$0xff] }
 0x92b   :  { %v3217_v42 = vpop.eup %3216 }
 0x92c   :  { %v1327_v31 = vmul.f32 %v3217_v42, %v1295_v19  ;;  %v1336_v43 = vmul.f32 %v2661_v39, %v1328_v38 }
 0x92e   :  { %v1335_v45 = vmul.f32 %v2661_v39, %v1327_v31  ;;  %v1344_v47 = vadd.f32 %v2662_v44, %v1336_v43  ;;  %v1493_v31 = vld [vmem:[%s4232_s4 + $0xa0] sm:$0xff] }
 0x930   :  { %v1343_v29 = vadd.f32 %v2662_v44, %v1335_v45 }
 0x932   :  { %v3219_v50 = vpop.eup %3218  ;;  %3017 = vmatprep.mubr.msk.f32.mxu1 %vm63_vm0, %v1343_v29  ;;  %v1496_v29 = vld [vmem:[%s4232_s4 + $0xb8] sm:$0xff] }
 0x933   :  { %3018 = vmatmul.mubr.msk.f32.vlgmr.msra.gmra.mxu1 %vm63_vm0, %v1344_v47  ;;  %v1329_v17 = vmul.f32 %v3219_v50, %v1297_v15 }
 0x935   :  { %v1337_v41 = vmul.f32 %v2661_v39, %v1329_v17 }
 0x936   :  { %v3221_v51 = vpop.eup %3220 }
 0x937   :  { %v1345_v54 = vadd.f32 %v2662_v44, %v1337_v41  ;;  %v1330_v55 = vmul.f32 %v3221_v51, %v1298_v20  ;;  %v1495_v41 = vld [vmem:[%s4232_s4 + $0xb0] sm:$0xff] }
 0x939   :  { %3020 = vmatprep.mubr.msk.f32.mxu1 %vm63_vm0, %v1345_v54  ;;  %v1338_v0 = vmul.f32 %v2661_v39, %v1330_v55 }
 0x93b   :  { %v1346_v26 = vadd.f32 %v2662_v44, %v1338_v0  ;;  %v1498_v0 = vld [vmem:[%s4232_s4 + $0xc8] sm:$0xff] }
 0x93d   :  { %3021 = vmatmul.mubr.msk.f32.gmra.mxu1 %vm63_vm0, %v1346_v26 }
 0x9f3   :  { %v3019_v2 = vpop.f32.mrf.mxu1 }
 0x9f4   :  { %v3862_v24 = vadd.f32 %v3019_v2, %v2663_v46 }
 0x9f5   :  { %v1434_v3 = vpop.f32.mrf.mxu1 }
 0x9f6   :  { %v3848_v16 = vadd.f32 %v2663_v46, %v1434_v3  ;;  %v1459_v19 = vmul.f32 %v2668_v22, %v3862_v24  ;;  %v1468_v30 = vmul.f32 %v2669_v5, %v3862_v24  ;;  %v1477_v12 = vmul.f32 %v2670_v11, %v3862_v24  ;;  %v1497_v3 = vld [vmem:[%s4232_s4 + $0xc0] sm:$0xff] }
 0x9f7   :  { %v1486_v34 = vmul.f32 %v2671_v59, %v3862_v24 }
 0x9f8   :  { %v1458_v52 = vmul.f32 %v2668_v22, %v3848_v16  ;;  %v1467_v13 = vmul.f32 %v2669_v5, %v3848_v16  ;;  %v1476_v56 = vmul.f32 %v2670_v11, %v3848_v16  ;;  %v1485_v27 = vmul.f32 %v2671_v59, %v3848_v16 }
 0x9fa   :  { %3031 = vmatprep.mubr.msk.f32.mxu1 %vm63_vm0, %v1458_v52 }
 0x9fd   :  { %v3022_v7 = vpop.f32.mrf.mxu1 }
 0x9fe   :  { %v3852_v53 = vadd.f32 %v3022_v7, %v2663_v46 }
 0x9ff   :  { %v1444_v10 = vpop.f32.mrf.mxu1 }
 0xa00   :  { %v3854_v61 = vadd.f32 %v2663_v46, %v1444_v10  ;;  %3023 = vmatprep.subr.msk.mxu1 %vm63_vm0, %v3852_v53  ;;  %v1461_v62 = vmul.f32 %v2668_v22, %v3852_v53  ;;  %v1470_v15 = vmul.f32 %v2669_v5, %v3852_v53  ;;  %v1479_v63 = vmul.f32 %v2670_v11, %v3852_v53  ;;  %v1500_v10 = vld [vmem:[%s4232_s4 + $0xd8] sm:$0xff] }
 0xa01   :  { %3024 = vmatpush3.xpose.msk.msra.mxu1 %vm63_vm0, %v3852_v53  ;;  %v1488_v14 = vmul.f32 %v2671_v59, %v3852_v53 }
 0xa02   :  { %3025 = vmatprep.subr.msk.mxu1 %vm63_vm0, %v3854_v61  ;;  %v1460_v33 = vmul.f32 %v2668_v22, %v3854_v61  ;;  %v1469_v6 = vmul.f32 %v2669_v5, %v3854_v61  ;;  %v1478_v20 = vmul.f32 %v2670_v11, %v3854_v61  ;;  %v1487_v48 = vmul.f32 %v2671_v59, %v3854_v61  ;;  %v1499_v5 = vld [vmem:[%s4232_s4 + $0xd0] sm:$0xff] }
 0xa05   :  { %3026 = vmatpush3.xpose.msk.msra.mxu1 %vm63_vm0, %v3854_v61 }
 0xa06   :  { %3027 = vmatprep.subr.msk.mxu1 %vm63_vm0, %v3862_v24 }
 0xa09   :  { %3028 = vmatpush3.xpose.msk.msra.mxu1 %vm63_vm0, %v3862_v24 }
 0xa0a   :  { %3029 = vmatprep.subr.msk.mxu1 %vm63_vm0, %v3848_v16 }
 0xa0d   :  { %3030 = vmatpush3.xpose.msk.msra.mxu1 %vm63_vm0, %v3848_v16 }
 0xa10   :  { %3032 = vmatmul.mubr.msk.f32.vlgmr.msra.gmra.mxu1 %vm63_vm0, %v1459_v19 }
 0xa11   :  { %3034 = vmatprep.mubr.msk.f32.mxu1 %vm63_vm0, %v1460_v33 }
 0xa14   :  { %3035 = vmatmul.mubr.msk.f32.gmra.mxu1 %vm63_vm0, %v1461_v62 }
 0xa15   :  { %3037 = vmatprep.mubr.msk.f32.mxu1 %vm63_vm0, %v1467_v13 }
 0xa18   :  { %3038 = vmatmul.mubr.msk.f32.gmra.mxu1 %vm63_vm0, %v1468_v30 }
 0xa19   :  { %3040 = vmatprep.mubr.msk.f32.mxu1 %vm63_vm0, %v1469_v6 }
 0xa1c   :  { %3041 = vmatmul.mubr.msk.f32.gmra.mxu1 %vm63_vm0, %v1470_v15  ;;  %v1502_v15 = vld [vmem:[%s4232_s4 + $0xe8] sm:$0xff] }
 0xa1d   :  { %3043 = vmatprep.mubr.msk.f32.mxu1 %vm63_vm0, %v1476_v56 }
 0xa20   :  { %3044 = vmatmul.mubr.msk.f32.gmra.mxu1 %vm63_vm0, %v1477_v12 }
 0xa21   :  { %3046 = vmatprep.mubr.msk.f32.mxu1 %vm63_vm0, %v1478_v20  ;;  %v1501_v20 = vld [vmem:[%s4232_s4 + $0xe0] sm:$0xff] }
 0xa24   :  { %3047 = vmatmul.mubr.msk.f32.gmra.mxu1 %vm63_vm0, %v1479_v63 }
 0xa25   :  { %3049 = vmatprep.mubr.msk.f32.mxu1 %vm63_vm0, %v1485_v27 }
 0xa28   :  { %3050 = vmatmul.mubr.msk.f32.gmra.mxu1 %vm63_vm0, %v1486_v34  ;;  %v1504_v34 = vld [vmem:[%s4232_s4 + $0xf8] sm:$0xff] }
 0xa29   :  { %3052 = vmatprep.mubr.msk.f32.mxu1 %vm63_vm0, %v1487_v48 }
 0xa2c   :  { %3053 = vmatmul.mubr.msk.f32.gmra.mxu1 %vm63_vm0, %v1488_v14 }
 0xad0   :  { %v3033_v23 = vpop.f32.mrf.mxu1 }
 0xad1   :  { %v3910_v58 = vadd.f32 %v3033_v23, %v1490_v49  ;;  %v1503_v23 = vld [vmem:[%s4232_s4 + $0xf0] sm:$0xff] }
 0xad2   :  { %v1631_v25 = vpop.f32.mrf.mxu1 }
 0xad3   :  { %v3915_v1 = vadd.f32 %v1631_v25, %v1489_v57  ;;  %v1713_v28 = vsel %vm63_vm0, %v3910_v58, -inf }
 0xad4   :  { %1714 = vmax.xlane.f32.xlu1 %v1713_v28  ;;  %v3036_v32 = vpop.f32.mrf.mxu1 }
 0xad5   :  { %v3922_v35 = vadd.f32 %v3036_v32, %v1492_v21  ;;  %v1710_v8 = vsel %vm63_vm0, %v3915_v1, -inf }
 0xad6   :  { %1711 = vmax.xlane.f32.xlu0 %v1710_v8  ;;  %v1641_v18 = vpop.f32.mrf.mxu1 }
 0xad7   :  { %v3929_v38 = vadd.f32 %v1641_v18, %v1491_v9  ;;  %v1719_v39 = vsel %vm63_vm0, %v3922_v35, -inf }
 0xad8   :  { %1720 = vmax.xlane.f32.xlu1 %v1719_v39  ;;  %v3039_v42 = vpop.f32.mrf.mxu1 }
 0xad9   :  { %v3936_v43 = vadd.f32 %v3039_v42, %v1494_v36  ;;  %v1716_v44 = vsel %vm63_vm0, %v3929_v38, -inf }
 0xada   :  { %v1651_v45 = vpop.f32.mrf.mxu1  ;;  %1717 = vmax.xlane.f32.xlu0 %v1716_v44 }
 0xadb   :  { %v3943_v47 = vadd.f32 %v1651_v45, %v1493_v31  ;;  %v1725_v50 = vsel %vm63_vm0, %v3936_v43, -inf }
 0xadc   :  { %1726 = vmax.xlane.f32.xlu1 %v1725_v50  ;;  %v3042_v17 = vpop.f32.mrf.mxu1 }
 0xadd   :  { %v3950_v51 = vadd.f32 %v3042_v17, %v1496_v29  ;;  %v1722_v54 = vsel %vm63_vm0, %v3943_v47, -inf }
 0xade   :  { %v1661_v55 = vpop.f32.mrf.mxu1  ;;  %1723 = vmax.xlane.f32.xlu0 %v1722_v54 }
 0xadf   :  { %v3957_v26 = vadd.f32 %v1661_v55, %v1495_v41  ;;  %v1731_v2 = vsel %vm63_vm0, %v3950_v51, -inf }
 0xae0   :  { %1732 = vmax.xlane.f32.xlu1 %v1731_v2  ;;  %v3045_v46 = vpop.f32.mrf.mxu1 }
 0xae1   :  { %v3964_v22 = vadd.f32 %v3045_v46, %v1498_v0  ;;  %v1728_v52 = vsel %vm63_vm0, %v3957_v26, -inf }
 0xae2   :  { %v1671_v7 = vpop.f32.mrf.mxu1  ;;  %1729 = vmax.xlane.f32.xlu0 %v1728_v52 }
 0xae3   :  { %v3971_v19 = vadd.f32 %v1671_v7, %v1497_v3  ;;  %v1737_v33 = vsel %vm63_vm0, %v3964_v22, -inf }
 0xae4   :  { %1738 = vmax.xlane.f32.xlu1 %v1737_v33  ;;  %v3048_v62 = vpop.f32.mrf.mxu1 }
 0xae5   :  { %v3978_v13 = vadd.f32 %v3048_v62, %v1500_v10  ;;  %v1734_v30 = vsel %vm63_vm0, %v3971_v19, -inf }
 0xae6   :  { %v1681_v6 = vpop.f32.mrf.mxu1  ;;  %1735 = vmax.xlane.f32.xlu0 %v1734_v30 }
 0xae7   :  { %v3985_v11 = vadd.f32 %v1681_v6, %v1499_v5  ;;  %v1743_v56 = vsel %vm63_vm0, %v3978_v13, -inf }
 0xae8   :  { %1744 = vmax.xlane.f32.xlu1 %v1743_v56  ;;  %v3051_v12 = vpop.f32.mrf.mxu1 }
 0xae9   :  { %v3992_v63 = vadd.f32 %v3051_v12, %v1502_v15  ;;  %v1740_v59 = vsel %vm63_vm0, %v3985_v11, -inf }
 0xaea   :  { %v1691_v27 = vpop.f32.mrf.mxu1  ;;  %1741 = vmax.xlane.f32.xlu0 %v1740_v59 }
 0xaeb   :  { %v3999_v48 = vadd.f32 %v1691_v27, %v1501_v20  ;;  %v1749_v14 = vsel %vm63_vm0, %v3992_v63, -inf }
 0xaec   :  { %1750 = vmax.xlane.f32.xlu1 %v1749_v14  ;;  %v3054_v49 = vpop.f32.mrf.mxu1 }
 0xaed   :  { %v4006_v57 = vadd.f32 %v3054_v49, %v1504_v34  ;;  %v1746_v25 = vsel %vm63_vm0, %v3999_v48, -inf }
 0xaee   :  { %v1701_v21 = vpop.f32.mrf.mxu1  ;;  %1747 = vmax.xlane.f32.xlu0 %v1746_v25 }
 0xaef   :  { %v4010_v28 = vadd.f32 %v1701_v21, %v1503_v23  ;;  %v1755_v32 = vsel %vm63_vm0, %v4006_v57, -inf }
 0xaf0   :  { %1756 = vmax.xlane.f32.xlu1 %v1755_v32 }
 0xaf1   :  { %v1752_v9 = vsel %vm63_vm0, %v4010_v28, -inf }
 0xaf2   :  { %1753 = vmax.xlane.f32.xlu0 %v1752_v9 }
 0xb01   :  { %1890 = vrot.lane.b32.xlu1 %v3854_v61, %s3325_s2 }
 0xb08   :  { %1892 = vrot.lane.b32.xlu0 %v3852_v53, %s3325_s2 }
 0xb5d   :  { %v1715_v8 = vpop.xlane.xlu1 %1714 }
 0xb5e   :  { %v1759_v18 = vsub.f32 %v3910_v58, %v1715_v8 }
 0xb5f   :  { %v1712_v36 = vpop.xlane.xlu0 %1711 }
 0xb60   :  { %v1776_v39 = vmul.f32 1.442695, %v1759_v18  ;;  %v1758_v42 = vsub.f32 %v3915_v1, %v1712_v36 }
 0xb61   :  { %v1721_v31 = vpop.xlane.xlu1 %1720 }
 0xb62   :  { %3222 = vpow2.f32 %v1776_v39  ;;  %v1774_v44 = vmul.f32 1.442695, %v1758_v42  ;;  %v1761_v45 = vsub.f32 %v3922_v35, %v1721_v31 }
 0xb63   :  { %v1718_v29 = vpop.xlane.xlu0 %1717 }
 0xb64   :  { %3224 = vpow2.f32 %v1774_v44  ;;  %v1780_v50 = vmul.f32 1.442695, %v1761_v45  ;;  %v1760_v61 = vsub.f32 %v3929_v38, %v1718_v29 }
 0xb65   :  { %v1727_v17 = vpop.xlane.xlu1 %1726 }
 0xb66   :  { %3226 = vpow2.f32 %v1780_v50  ;;  %v1778_v53 = vmul.f32 1.442695, %v1760_v61  ;;  %v1763_v41 = vsub.f32 %v3936_v43, %v1727_v17 }
 0xb67   :  { %v1724_v58 = vpop.xlane.xlu0 %1723 }
 0xb68   :  { %3228 = vpow2.f32 %v1778_v53  ;;  %v1784_v54 = vmul.f32 1.442695, %v1763_v41  ;;  %v1762_v1 = vsub.f32 %v3943_v47, %v1724_v58 }
 0xb69   :  { %v1733_v55 = vpop.xlane.xlu1 %1732 }
 0xb6a   :  { %3230 = vpow2.f32 %v1784_v54  ;;  %v1782_v0 = vmul.f32 1.442695, %v1762_v1  ;;  %v1765_v35 = vsub.f32 %v3950_v51, %v1733_v55 }
 0xb6b   :  { %v1730_v2 = vpop.xlane.xlu0 %1729 }
 0xb6c   :  { %3232 = vpow2.f32 %v1782_v0  ;;  %v1788_v46 = vmul.f32 1.442695, %v1765_v35  ;;  %v1764_v38 = vsub.f32 %v3957_v26, %v1730_v2 }
 0xb6d   :  { %v1739_v3 = vpop.xlane.xlu1 %1738 }
 0xb6e   :  { %3234 = vpow2.f32 %v1788_v46  ;;  %v1786_v52 = vmul.f32 1.442695, %v1764_v38  ;;  %v1767_v43 = vsub.f32 %v3964_v22, %v1739_v3 }
 0xb6f   :  { %v4029_v7 = vpop.eup %3222  ;;  %v1736_v10 = vpop.xlane.xlu0 %1735 }
 0xb70   :  { %3236 = vpow2.f32 %v1786_v52  ;;  %v1792_v47 = vmul.f32 1.442695, %v1767_v43  ;;  %v1766_v33 = vsub.f32 %v3971_v19, %v1736_v10  ;;  %v1809_v51 = vsel %vm63_vm0, %v4029_v7, 0.0 }
 0xb71   :  { %v4034_v62 = vpop.eup %3224  ;;  %v1745_v5 = vpop.xlane.xlu1 %1744  ;;  %1810 = vadd.xlane.f32.xlu1 %v1809_v51 }
 0xb72   :  { %3238 = vpow2.f32 %v1792_v47  ;;  %v1790_v26 = vmul.f32 1.442695, %v1766_v33  ;;  %v1769_v30 = vsub.f32 %v3978_v13, %v1745_v5  ;;  %v1806_v22 = vsel %vm63_vm0, %v4034_v62, 0.0 }
 0xb73   :  { %v4039_v6 = vpop.eup %3226  ;;  %1807 = vadd.xlane.f32.xlu0 %v1806_v22  ;;  %v1742_v15 = vpop.xlane.xlu0 %1741 }
 0xb74   :  { %3240 = vpow2.f32 %v1790_v26  ;;  %v1796_v19 = vmul.f32 1.442695, %v1769_v30  ;;  %v1768_v56 = vsub.f32 %v3985_v11, %v1742_v15  ;;  %v1815_v12 = vsel %vm63_vm0, %v4039_v6, 0.0 }
 0xb75   :  { %v4044_v20 = vpop.eup %3228  ;;  %v1751_v59 = vpop.xlane.xlu1 %1750  ;;  %1816 = vadd.xlane.f32.xlu1 %v1815_v12 }
 0xb76   :  { %3242 = vpow2.f32 %v1796_v19  ;;  %v1794_v13 = vmul.f32 1.442695, %v1768_v56  ;;  %v1812_v27 = vsel %vm63_vm0, %v4044_v20, 0.0  ;;  %v1771_v41 = vsub.f32 %v3992_v63, %v1751_v59 }
 0xb77   :  { %v4048_v34 = vpop.eup %3230  ;;  %1813 = vadd.xlane.f32.xlu0 %v1812_v27  ;;  %v1748_v14 = vpop.xlane.xlu0 %1747 }
 0xb78   :  { %3244 = vpow2.f32 %v1794_v13  ;;  %v1821_v11 = vsel %vm63_vm0, %v4048_v34, 0.0  ;;  %v1770_v53 = vsub.f32 %v3999_v48, %v1748_v14  ;;  %v1800_v1 = vmul.f32 1.442695, %v1771_v41 }
 0xb79   :  { %v4052_v49 = vpop.eup %3232  ;;  %1822 = vadd.xlane.f32.xlu1 %v1821_v11  ;;  %v1757_v21 = vpop.xlane.xlu1 %1756 }
 0xb7a   :  { %v1818_v23 = vsel %vm63_vm0, %v4052_v49, 0.0  ;;  %v1798_v58 = vmul.f32 1.442695, %v1770_v53  ;;  %v1773_v55 = vsub.f32 %v4006_v57, %v1757_v21 }
 0xb7b   :  { %v4056_v25 = vpop.eup %3234  ;;  %1819 = vadd.xlane.f32.xlu0 %v1818_v23  ;;  %v1754_v32 = vpop.xlane.xlu0 %1753 }
 0xb7c   :  { %v1827_v9 = vsel %vm63_vm0, %v4056_v25, 0.0  ;;  %v1772_v54 = vsub.f32 %v4010_v28, %v1754_v32  ;;  %3246 = vpow2.f32 %v1798_v58  ;;  %v1804_v35 = vmul.f32 1.442695, %v1773_v55 }
 0xb7d   :  { %v4060_v8 = vpop.eup %3236  ;;  %1828 = vadd.xlane.f32.xlu1 %v1827_v9  ;;  %v1891_v44 = vpop.permute.xlu1 %1890  ;;  %3248 = vpow2.f32 %v1800_v1 }
 0xb7e   :  { %v1824_v18 = vsel %vm63_vm0, %v4060_v8, 0.0  ;;  %v1802_v0 = vmul.f32 1.442695, %v1772_v54 }
 0xb7f   :  { %v4064_v36 = vpop.eup %3238  ;;  %1825 = vadd.xlane.f32.xlu0 %v1824_v18  ;;  %v1893_v39 = vpop.permute.xlu0 %1892 }
 0xb80   :  { %3055 = vmatprep.subr.mxu0 %v1893_v39  ;;  %v1833_v42 = vsel %vm63_vm0, %v4064_v36, 0.0  ;;  %3250 = vpow2.f32 %v1802_v0  ;;  %v2122_v0 = vld [vmem:[%s4231_s3 + $0xd8] sm:$0xff] }
 0xb81   :  { %v4068_v31 = vpop.eup %3240  ;;  %1834 = vadd.xlane.f32.xlu1 %v1833_v42  ;;  %3056 = vmatpush3.msra.mxu0 %v1893_v39  ;;  %3252 = vpow2.f32 %v1804_v35  ;;  %v2121_v35 = vld [vmem:[%s4231_s3 + $0xd0] sm:$0xff] }
 0xb82   :  { %3057 = vmatprep.subr.mxu0 %v1891_v44  ;;  %v1830_v45 = vsel %vm63_vm0, %v4068_v31, 0.0 }
 0xb83   :  { %v4072_v29 = vpop.eup %3242  ;;  %1831 = vadd.xlane.f32.xlu0 %v1830_v45  ;;  %3058 = vmatpush3.msra.mxu0 %v1891_v44 }
 0xb84   :  { %v1839_v50 = vsel %vm63_vm0, %v4072_v29, 0.0 }
 0xb85   :  { %v4076_v61 = vpop.eup %3244  ;;  %1840 = vadd.xlane.f32.xlu1 %v1839_v50 }
 0xb86   :  { %v1836_v17 = vsel %vm63_vm0, %v4076_v61, 0.0 }
 0xb87   :  { %1837 = vadd.xlane.f32.xlu0 %v1836_v17 }
 0xb96   :  { %1886 = vrot.lane.b32.xlu1 %v3848_v16, %s3325_s2  ;;  %v4088_v16 = vpop.eup %3246 }
 0xb97   :  { %v4090_v2 = vpop.eup %3248 }
 0xb98   :  { %v4094_v63 = vpop.eup %3250  ;;  %v1845_v48 = vsel %vm63_vm0, %v4090_v2, 0.0 }
 0xb99   :  { %v4098_v57 = vpop.eup %3252  ;;  %v1848_v28 = vsel %vm63_vm0, %v4094_v63, 0.0 }
 0xb9a   :  { %v1851_v46 = vsel %vm63_vm0, %v4098_v57, 0.0 }
 0xb9d   :  { %1888 = vrot.lane.b32.xlu0 %v3862_v24, %s3325_s2  ;;  %v1842_v24 = vsel %vm63_vm0, %v4088_v16, 0.0 }
 0xbba   :  { %1843 = vadd.xlane.f32.xlu1 %v1842_v24 }
 0xbbc   :  { %1846 = vadd.xlane.f32.xlu0 %v1845_v48 }
 0xbbe   :  { %1849 = vadd.xlane.f32.xlu1 %v1848_v28 }
 0xbc0   :  { %1852 = vadd.xlane.f32.xlu0 %v1851_v46 }
 0xbfa   :  { %v1811_v38 = vpop.xlane.xlu1 %1810 }
 0xbfc   :  { %v1808_v3 = vpop.xlane.xlu0 %1807 }
 0xbfd   :  { %3254 = vrcp.f32 %v1808_v3 }
 0xbfe   :  { %v1817_v52 = vpop.xlane.xlu1 %1816  ;;  %3256 = vrcp.f32 %v1811_v38 }
 0xc00   :  { %v1814_v43 = vpop.xlane.xlu0 %1813 }
 0xc01   :  { %3258 = vrcp.f32 %v1814_v43 }
 0xc02   :  { %v1823_v10 = vpop.xlane.xlu1 %1822  ;;  %3260 = vrcp.f32 %v1817_v52 }
 0xc04   :  { %v1820_v47 = vpop.xlane.xlu0 %1819 }
 0xc05   :  { %3262 = vrcp.f32 %v1820_v47  ;;  %v3296_v47 = vld [vmem:[#allocation2 + $0x5] ss:$0 sm:$0xff] }
 0xc06   :  { %v1829_v33 = vpop.xlane.xlu1 %1828  ;;  %3264 = vrcp.f32 %v1823_v10 }
 0xc08   :  { %v1826_v51 = vpop.xlane.xlu0 %1825 }
 0xc09   :  { %3266 = vrcp.f32 %v1826_v51 }
 0xc0a   :  { %v3255_v5 = vpop.eup %3254  ;;  %v1835_v26 = vpop.xlane.xlu1 %1834  ;;  %3268 = vrcp.f32 %v1829_v33 }
 0xc0b   :  { %v1870_v30 = vmul.f32 %v3255_v5, %v4034_v62  ;;  %v3257_v56 = vpop.eup %3256 }
 0xc0c   :  { %v1832_v22 = vpop.xlane.xlu0 %1831  ;;  %v1871_v27 = vmul.f32 %v3257_v56, %v4029_v7 }
 0xc0d   :  { %3063 = vmatprep.mubr.msk.f32.mxu0 %vm63_vm0, %v1870_v30  ;;  %3270 = vrcp.f32 %v1832_v22  ;;  %v3298_v22 = vld [vmem:[#allocation2 + $0x6] ss:$0 sm:$0xff] }
 0xc0e   :  { %v1841_v15 = vpop.xlane.xlu1 %1840  ;;  %v3259_v59 = vpop.eup %3258  ;;  %3272 = vrcp.f32 %v1835_v26  ;;  %v3297_v26 = vld [vmem:[#allocation2 + $0x4] ss:$0 sm:$0xff] }
 0xc0f   :  { %v3261_v62 = vpop.eup %3260  ;;  %v1872_v14 = vmul.f32 %v3259_v59, %v4044_v20 }
 0xc10   :  { %v1838_v19 = vpop.xlane.xlu0 %1837  ;;  %v1873_v23 = vmul.f32 %v3261_v62, %v4039_v6 }
 0xc11   :  { %3274 = vrcp.f32 %v1838_v19 }
 0xc12   :  { %v1887_v13 = vpop.permute.xlu1 %1886  ;;  %v3263_v11 = vpop.eup %3262  ;;  %3276 = vrcp.f32 %v1841_v15 }
 0xc13   :  { %v3265_v21 = vpop.eup %3264  ;;  %v1874_v32 = vmul.f32 %v3263_v11, %v4052_v49 }
 0xc14   :  { %v1889_v12 = vpop.permute.xlu0 %1888  ;;  %v1875_v7 = vmul.f32 %v3265_v21, %v4048_v34 }
 0xc15   :  { %3059 = vmatprep.subr.mxu0 %v1889_v12 }
 0xc16   :  { %3060 = vmatpush3.msra.mxu0 %v1889_v12  ;;  %v3267_v9 = vpop.eup %3266 }
 0xc17   :  { %3061 = vmatprep.subr.mxu0 %v1887_v13  ;;  %v3269_v18 = vpop.eup %3268  ;;  %v1876_v20 = vmul.f32 %v3267_v9, %v4060_v8 }
 0xc18   :  { %3062 = vmatpush3.msra.mxu0 %v1887_v13  ;;  %v1877_v6 = vmul.f32 %v3269_v18, %v4056_v25 }
 0xc19   :  { %3064 = vmatmul.mubr.msk.f32.vlgmr.msra.gmra.mxu0 %vm63_vm0, %v1871_v27  ;;  %3087 = vmatprep.subr.mxu0 %v2122_v0 }
 0xc1a   :  { %3066 = vmatprep.mubr.msk.f32.mxu0 %vm63_vm0, %v1872_v14  ;;  %v3271_v39 = vpop.eup %3270  ;;  %3088 = vmatpush3.msra.mxu0 %v2122_v0  ;;  %v3299_v14 = vld [vmem:[#allocation2 + $0x7] ss:$0 sm:$0xff] }
 0xc1b   :  { %v3273_v42 = vpop.eup %3272  ;;  %v1878_v49 = vmul.f32 %v3271_v39, %v4068_v31  ;;  %3089 = vmatprep.subr.mxu0 %v2121_v35 }
 0xc1c   :  { %v1879_v34 = vmul.f32 %v3273_v42, %v4064_v36  ;;  %3090 = vmatpush3.msra.mxu0 %v2121_v35 }
 0xc1d   :  { %3067 = vmatmul.mubr.msk.f32.gmra.mxu0 %vm63_vm0, %v1873_v23 }
 0xc1e   :  { %3069 = vmatprep.mubr.msk.f32.mxu0 %vm63_vm0, %v1874_v32  ;;  %v3275_v44 = vpop.eup %3274 }
 0xc1f   :  { %v3277_v45 = vpop.eup %3276  ;;  %v1880_v8 = vmul.f32 %v3275_v44, %v4076_v61 }
 0xc20   :  { %v1881_v50 = vmul.f32 %v3277_v45, %v4072_v29 }
 0xc21   :  { %3070 = vmatmul.mubr.msk.f32.gmra.mxu0 %vm63_vm0, %v1875_v7 }
 0xc22   :  { %3072 = vmatprep.mubr.msk.f32.mxu0 %vm63_vm0, %v1876_v20 }
 0xc25   :  { %3073 = vmatmul.mubr.msk.f32.gmra.mxu0 %vm63_vm0, %v1877_v6 }
 0xc26   :  { %3075 = vmatprep.mubr.msk.f32.mxu0 %vm63_vm0, %v1878_v49 }
 0xc29   :  { %3076 = vmatmul.mubr.msk.f32.gmra.mxu0 %vm63_vm0, %v1879_v34 }
 0xc2a   :  { %3078 = vmatprep.mubr.msk.f32.mxu0 %vm63_vm0, %v1880_v8 }
 0xc2d   :  { %3079 = vmatmul.mubr.msk.f32.gmra.mxu0 %vm63_vm0, %v1881_v50 }
 0xc43   :  { %v1844_v25 = vpop.xlane.xlu1 %1843 }
 0xc44   :  { %3278 = vrcp.f32 %v1844_v25 }
 0xc45   :  { %v1847_v31 = vpop.xlane.xlu0 %1846 }
 0xc46   :  { %3280 = vrcp.f32 %v1847_v31 }
 0xc47   :  { %v1850_v17 = vpop.xlane.xlu1 %1849 }
 0xc48   :  { %3282 = vrcp.f32 %v1850_v17 }
 0xc49   :  { %v1853_v53 = vpop.xlane.xlu0 %1852 }
 0xc4a   :  { %3284 = vrcp.f32 %v1853_v53 }
 0xc51   :  { %v3279_v36 = vpop.eup %3278 }
 0xc52   :  { %v1882_v41 = vmul.f32 %v3279_v36, %v4088_v16  ;;  %v2120_v16 = vld [vmem:[%s4231_s3 + $0xc8] sm:$0xff]  ;;  %v2708_v36 = vld [vmem:[#allocation2 + $0x17] ss:$0 sm:$0xff] }
 0xc53   :  { %v3281_v61 = vpop.eup %3280  ;;  %3091 = vmatprep.subr.mxu0 %v2120_v16 }
 0xc54   :  { %3081 = vmatprep.mubr.msk.f32.mxu0 %vm63_vm0, %v1882_v41  ;;  %v1883_v58 = vmul.f32 %v3281_v61, %v4090_v2  ;;  %v2119_v2 = vld [vmem:[%s4231_s3 + $0xc0] sm:$0xff]  ;;  %3092 = vmatpush3.msra.mxu0 %v2120_v16 }
 0xc55   :  { %v3283_v54 = vpop.eup %3282  ;;  %3093 = vmatprep.subr.mxu0 %v2119_v2 }
 0xc56   :  { %3082 = vmatmul.mubr.msk.f32.gmra.mxu0 %vm63_vm0, %v1883_v58  ;;  %v1884_v29 = vmul.f32 %v3283_v54, %v4094_v63 }
 0xc57   :  { %v3285_v1 = vpop.eup %3284  ;;  %3094 = vmatpush3.msra.mxu0 %v2119_v2 }
 0xc58   :  { %3084 = vmatprep.mubr.msk.f32.mxu0 %vm63_vm0, %v1884_v29  ;;  %v1885_v55 = vmul.f32 %v3285_v1, %v4098_v57 }
 0xc5a   :  { %3085 = vmatmul.mubr.msk.f32.gmra.mxu0 %vm63_vm0, %v1885_v55 }
 0xcd9   :  { %v3065_v24 = vpop.f32.mrf.mxu0 }
 0xcda   :  { %v2092_v19 = vmul.f32 %v3297_v26, %v3065_v24 }
 0xcdb   :  { %v2012_v63 = vpop.f32.mrf.mxu0 }
 0xcdc   :  { %v2091_v30 = vmul.f32 %v3297_v26, %v2012_v63 }
 0xcdd   :  { %v3068_v48 = vpop.f32.mrf.mxu0 }
 0xcde   :  { %v2094_v18 = vmul.f32 %v3297_v26, %v3068_v48 }
 0xcdf   :  { %v2022_v57 = vpop.f32.mrf.mxu0 }
 0xce0   :  { %v2093_v21 = vmul.f32 %v3297_v26, %v2022_v57  ;;  %v2302_v57 = vld [vmem:[%s4231_s3 + $0xf8] sm:$0xff] }
 0xce1   :  { %v3071_v28 = vpop.f32.mrf.mxu0  ;;  %3101 = vmatprep.subr.mxu1 %v2302_v57 }
 0xce2   :  { %v2096_v51 = vmul.f32 %v3296_v47, %v3071_v28  ;;  %3102 = vmatpush3.msra.mxu1 %v2302_v57  ;;  %v2715_v57 = vld [vmem:[#allocation2 + $0x1a] ss:$0 sm:$0xff] }
 0xce3   :  { %v2032_v46 = vpop.f32.mrf.mxu0 }
 0xce4   :  { %v2095_v33 = vmul.f32 %v3296_v47, %v2032_v46  ;;  %v2100_v27 = vadd.f32 %v2096_v51, %v2092_v19 }
 0xce5   :  { %v3074_v38 = vpop.f32.mrf.mxu0 }
 0xce6   :  { %v2099_v59 = vadd.f32 %v2095_v33, %v2091_v30  ;;  %v2098_v62 = vmul.f32 %v3296_v47, %v3074_v38 }
 0xce7   :  { %v2042_v3 = vpop.f32.mrf.mxu0 }
 0xce8   :  { %v2097_v13 = vmul.f32 %v3296_v47, %v2042_v3  ;;  %v2102_v44 = vadd.f32 %v2098_v62, %v2094_v18 }
 0xce9   :  { %v3077_v52 = vpop.f32.mrf.mxu0 }
 0xcea   :  { %v2104_v56 = vmul.f32 %v3298_v22, %v3077_v52  ;;  %v2101_v42 = vadd.f32 %v2097_v13, %v2093_v21  ;;  %v2300_v13 = vld [vmem:[%s4231_s3 + $0xe8] sm:$0xff] }
 0xceb   :  { %v2052_v43 = vpop.f32.mrf.mxu0 }
 0xcec   :  { %v2103_v15 = vmul.f32 %v3298_v22, %v2052_v43  ;;  %v2108_v20 = vadd.f32 %v2104_v56, %v2100_v27  ;;  %v2299_v27 = vld [vmem:[%s4231_s3 + $0xe0] sm:$0xff] }
 0xced   :  { %v3080_v10 = vpop.f32.mrf.mxu0 }
 0xcee   :  { %v2107_v32 = vadd.f32 %v2103_v15, %v2099_v59  ;;  %v2106_v39 = vmul.f32 %v3298_v22, %v3080_v10  ;;  %v2301_v59 = vld [vmem:[%s4231_s3 + $0xf0] sm:$0xff] }
 0xcef   :  { %v2062_v5 = vpop.f32.mrf.mxu0  ;;  %3103 = vmatprep.subr.mxu1 %v2301_v59 }
 0xcf0   :  { %v2105_v9 = vmul.f32 %v3298_v22, %v2062_v5  ;;  %v2110_v31 = vadd.f32 %v2106_v39, %v2102_v44  ;;  %3104 = vmatpush3.msra.mxu1 %v2301_v59  ;;  %v2713_v44 = vld [vmem:[#allocation2 + $0x18] ss:$0 sm:$0xff] }
 0xcf1   :  { %3105 = vmatprep.subr.mxu1 %v2300_v13 }
 0xcf2   :  { %v2109_v50 = vadd.f32 %v2105_v9, %v2101_v42  ;;  %3106 = vmatpush3.msra.mxu1 %v2300_v13 }
 0xcf3   :  { %3107 = vmatprep.subr.mxu1 %v2299_v27 }
 0xcf4   :  { %3108 = vmatpush3.msra.mxu1 %v2299_v27 }
 0xd16   :  { %v3083_v12 = vpop.f32.mrf.mxu0 }
 0xd17   :  { %v2112_v11 = vmul.f32 %v3299_v14, %v3083_v12 }
 0xd18   :  { %v2072_v23 = vpop.f32.mrf.mxu0 }
 0xd19   :  { %v2111_v7 = vmul.f32 %v3299_v14, %v2072_v23  ;;  %v2116_v34 = vadd.f32 %v2112_v11, %v2108_v20 }
 0xd1a   :  { %v3086_v6 = vpop.f32.mrf.mxu0 }
 0xd1b   :  { %v2115_v49 = vadd.f32 %v2111_v7, %v2107_v32  ;;  %v2114_v45 = vmul.f32 %v3299_v14, %v3086_v6 }
 0xd1c   :  { %v2082_v8 = vpop.f32.mrf.mxu0 }
 0xd1d   :  { %v2113_v25 = vmul.f32 %v3299_v14, %v2082_v8  ;;  %3095 = vmatprep.mubr.msk.f32.mxu0 %vm63_vm0, %v2115_v49  ;;  %v2118_v53 = vadd.f32 %v2114_v45, %v2110_v31 }
 0xd1e   :  { %3096 = vmatmul.mubr.msk.f32.vlgmr.msra.gmra.mxu0 %vm63_vm0, %v2116_v34 }
 0xd1f   :  { %v2117_v17 = vadd.f32 %v2113_v25, %v2109_v50  ;;  %v2714_v25 = vld [vmem:[#allocation2 + $0x19] ss:$0 sm:$0xff] }
 0xd21   :  { %3098 = vmatprep.mubr.msk.f32.mxu0 %vm63_vm0, %v2117_v17 }
 0xd22   :  { %3099 = vmatmul.mubr.msk.f32.gmra.mxu0 %vm63_vm0, %v2118_v53 }
 0xdde   :  { %v3097_v41 = vpop.f32.mrf.mxu0 }
 0xddf   :  { %v2212_v61 = vadd.f32 %v3097_v41, %v2708_v36 }
 0xde0   :  { %v2206_v58 = vpop.f32.mrf.mxu0 }
 0xde1   :  { %v2207_v54 = vadd.f32 %v2708_v36, %v2206_v58  ;;  %v2226_v29 = vadd.f32 %v2212_v61, %v3805_v40 }
 0xde2   :  { %v3100_v1 = vpop.f32.mrf.mxu0 }
 0xde3   :  { %v4154_v55 = vadd.f32 %v2207_v54, %v3808_v60  ;;  %v2222_v0 = vadd.f32 %v3100_v1, %v2708_v36  ;;  %v2234_v35 = vsel %vm63_vm0, %v2226_v29, 0.0 }
 0xde4   :  { %2235 = vadd.xlane.f32.xlu1 %v2234_v35  ;;  %v2216_v16 = vpop.f32.mrf.mxu0  ;;  %v2435_v35 = vld [vmem:[%s4231_s3 + $0x130] sm:$0xff] }
 0xde5   :  { %v2217_v2 = vadd.f32 %v2708_v36, %v2216_v16  ;;  %v2231_v24 = vsel %vm63_vm0, %v4154_v55, 0.0  ;;  %v2228_v63 = vadd.f32 %v2222_v0, %v3818_v4  ;;  %v2436_v0 = vld [vmem:[%s4231_s3 + $0x138] sm:$0xff]  ;;  %v2434_v16 = vld [vmem:[%s4231_s3 + $0x128] sm:$0xff] }
 0xde6   :  { %2232 = vadd.xlane.f32.xlu0 %v2231_v24  ;;  %3115 = vmatprep.subr.mxu0 %v2436_v0  ;;  %v2432_v24 = vld [vmem:[%s4231_s3 + $0x118] sm:$0xff] }
 0xde7   :  { %v4161_v48 = vadd.f32 %v2217_v2, %v3816_v37  ;;  %v2240_v40 = vsel %vm63_vm0, %v2228_v63, 0.0  ;;  %3116 = vmatpush3.msra.mxu0 %v2436_v0  ;;  %v2433_v2 = vld [vmem:[%s4231_s3 + $0x120] sm:$0xff] }
 0xde8   :  { %2241 = vadd.xlane.f32.xlu1 %v2240_v40  ;;  %3117 = vmatprep.subr.mxu0 %v2435_v35  ;;  %v2430_v40 = vld [vmem:[%s4231_s3 + $0x108] sm:$0xff] }
 0xde9   :  { %v2237_v60 = vsel %vm63_vm0, %v4161_v48, 0.0  ;;  %3118 = vmatpush3.msra.mxu0 %v2435_v35 }
 0xdea   :  { %2238 = vadd.xlane.f32.xlu0 %v2237_v60  ;;  %3119 = vmatprep.subr.mxu0 %v2434_v16  ;;  %v2429_v60 = vld [vmem:[%s4231_s3 + $0x100] sm:$0xff] }
 0xdeb   :  { %3120 = vmatpush3.msra.mxu0 %v2434_v16 }
 0xdec   :  { %3121 = vmatprep.subr.mxu0 %v2433_v2 }
 0xded   :  { %3122 = vmatpush3.msra.mxu0 %v2433_v2 }
 0xdee   :  { %3123 = vmatprep.subr.mxu0 %v2432_v24 }
 0xdef   :  { %3124 = vmatpush3.msra.mxu0 %v2432_v24 }
 0xe6d   :  { %v2236_v28 = vpop.xlane.xlu1 %2235 }
 0xe6e   :  { %v2244_v46 = vmul.f32 0.03125, %v2236_v28 }
 0xe6f   :  { %v2233_v4 = vpop.xlane.xlu0 %2232 }
 0xe70   :  { %v2248_v38 = vsub.f32 %v2226_v29, %v2244_v46  ;;  %v2243_v3 = vmul.f32 0.03125, %v2233_v4 }
 0xe71   :  { %v2242_v37 = vpop.xlane.xlu1 %2241 }
 0xe72   :  { %v2247_v52 = vsub.f32 %v4154_v55, %v2243_v3  ;;  %v2246_v43 = vmul.f32 0.03125, %v2242_v37  ;;  %v2252_v10 = vmul.f32 %v2248_v38, %v2248_v38 }
 0xe73   :  { %v2239_v47 = vpop.xlane.xlu0 %2238 }
 0xe74   :  { %v2250_v33 = vsub.f32 %v2228_v63, %v2246_v43  ;;  %v2245_v51 = vmul.f32 0.03125, %v2239_v47  ;;  %v2258_v5 = vsel %vm63_vm0, %v2252_v10, 0.0  ;;  %v2251_v26 = vmul.f32 %v2247_v52, %v2247_v52  ;;  %v2431_v63 = vld [vmem:[%s4231_s3 + $0x110] sm:$0xff] }
 0xe75   :  { %2259 = vadd.xlane.f32.xlu1 %v2258_v5  ;;  %3125 = vmatprep.subr.mxu0 %v2431_v63 }
 0xe76   :  { %v2249_v30 = vsub.f32 %v4161_v48, %v2245_v51  ;;  %v2255_v22 = vsel %vm63_vm0, %v2251_v26, 0.0  ;;  %v2254_v15 = vmul.f32 %v2250_v33, %v2250_v33  ;;  %3126 = vmatpush3.msra.mxu0 %v2431_v63 }
 0xe77   :  { %2256 = vadd.xlane.f32.xlu0 %v2255_v22  ;;  %3127 = vmatprep.subr.mxu0 %v2430_v40 }
 0xe78   :  { %v2264_v19 = vsel %vm63_vm0, %v2254_v15, 0.0  ;;  %v2253_v56 = vmul.f32 %v2249_v30, %v2249_v30  ;;  %3128 = vmatpush3.msra.mxu0 %v2430_v40 }
 0xe79   :  { %2265 = vadd.xlane.f32.xlu1 %v2264_v19  ;;  %3129 = vmatprep.subr.mxu0 %v2429_v60 }
 0xe7a   :  { %v2261_v12 = vsel %vm63_vm0, %v2253_v56, 0.0  ;;  %3130 = vmatpush3.msra.mxu0 %v2429_v60 }
 0xe7b   :  { %2262 = vadd.xlane.f32.xlu0 %v2261_v12 }
 0xefe   :  { %v2260_v62 = vpop.xlane.xlu1 %2259 }
 0xeff   :  { %v2268_v14 = vmul.f32 0.03125, %v2260_v62 }
 0xf00   :  { %v2257_v11 = vpop.xlane.xlu0 %2256 }
 0xf01   :  { %v2272_v23 = vadd.f32 1e-05, %v2268_v14  ;;  %v2267_v21 = vmul.f32 0.03125, %v2257_v11 }
 0xf02   :  { %v2266_v32 = vpop.xlane.xlu1 %2265 }
 0xf03   :  { %3286 = vrsqrt.f32 %v2272_v23  ;;  %v2271_v9 = vadd.f32 1e-05, %v2267_v21  ;;  %v2270_v7 = vmul.f32 0.03125, %v2266_v32  ;;  %v2724_v23 = vld [vmem:[#allocation2 + $0x1b] ss:$0 sm:$0xff] }
 0xf04   :  { %v2263_v18 = vpop.xlane.xlu0 %2262 }
 0xf05   :  { %3288 = vrsqrt.f32 %v2271_v9  ;;  %v2274_v20 = vadd.f32 1e-05, %v2270_v7  ;;  %v2269_v39 = vmul.f32 0.03125, %v2263_v18 }
 0xf07   :  { %3290 = vrsqrt.f32 %v2274_v20  ;;  %v2273_v6 = vadd.f32 1e-05, %v2269_v39 }
 0xf09   :  { %3292 = vrsqrt.f32 %v2273_v6 }
 0xf10   :  { %v3287_v42 = vpop.eup %3286 }
 0xf11   :  { %v2280_v49 = vmul.f32 %v3287_v42, %v2248_v38 }
 0xf12   :  { %v3289_v34 = vpop.eup %3288 }
 0xf13   :  { %v2279_v45 = vmul.f32 %v3289_v34, %v2247_v52  ;;  %v2288_v50 = vmul.f32 %v2713_v44, %v2280_v49 }
 0xf14   :  { %v3291_v8 = vpop.eup %3290 }
 0xf15   :  { %v2287_v31 = vmul.f32 %v2713_v44, %v2279_v45  ;;  %v2282_v17 = vmul.f32 %v3291_v8, %v2250_v33  ;;  %v2296_v61 = vadd.f32 %v2714_v25, %v2288_v50  ;;  %v2725_v45 = vld [vmem:[#allocation2] ss:$0 sm:$0xff]  ;;  %v2726_v50 = vld [vmem:[#allocation2 + $0x1] ss:$0 sm:$0xff] }
 0xf16   :  { %v3293_v53 = vpop.eup %3292 }
 0xf17   :  { %v2295_v36 = vadd.f32 %v2714_v25, %v2287_v31  ;;  %v2281_v41 = vmul.f32 %v3293_v53, %v2249_v30  ;;  %v2290_v58 = vmul.f32 %v2713_v44, %v2282_v17  ;;  %v2727_v17 = vld [vmem:[#allocation2 + $0x2] ss:$0 sm:$0xff] }
 0xf19   :  { %3109 = vmatprep.mubr.msk.f32.mxu1 %vm63_vm0, %v2295_v36  ;;  %v2289_v54 = vmul.f32 %v2713_v44, %v2281_v41  ;;  %v2298_v1 = vadd.f32 %v2714_v25, %v2290_v58 }
 0xf1a   :  { %3110 = vmatmul.mubr.msk.f32.vlgmr.msra.gmra.mxu1 %vm63_vm0, %v2296_v61  ;;  %v2728_v61 = vld [vmem:[#allocation2 + $0x3] ss:$0 sm:$0xff] }
 0xf1b   :  { %v2297_v29 = vadd.f32 %v2714_v25, %v2289_v54 }
 0xf1d   :  { %3112 = vmatprep.mubr.msk.f32.mxu1 %vm63_vm0, %v2297_v29 }
 0xf1e   :  { %3113 = vmatmul.mubr.msk.f32.gmra.mxu1 %vm63_vm0, %v2298_v1 }
 0xfda   :  { %v3111_v28 = vpop.f32.mrf.mxu1 }
 0xfdb   :  { %v2392_v46 = vadd.f32 %v3111_v28, %v2715_v57 }
 0xfdc   :  { %v2386_v4 = vpop.f32.mrf.mxu1 }
 0xfdd   :  { %v2406_v38 = vmax.f32 %v2392_v46, 0.0  ;;  %v2387_v3 = vadd.f32 %v2715_v57, %v2386_v4 }
 0xfde   :  { %v3114_v37 = vpop.f32.mrf.mxu1 }
 0xfdf   :  { %v2405_v52 = vmax.f32 %v2387_v3, 0.0  ;;  %2415 = vrot.lane.b32.xlu1 %v2406_v38, %s3326_s13  ;;  %v2402_v47 = vadd.f32 %v3114_v37, %v2715_v57 }
 0xfe0   :  { %v2396_v43 = vpop.f32.mrf.mxu1 }
 0xfe1   :  { %v2397_v10 = vadd.f32 %v2715_v57, %v2396_v43  ;;  %2413 = vrot.lane.b32.xlu0 %v2405_v52, %s3326_s13  ;;  %v2408_v51 = vmax.f32 %v2402_v47, 0.0 }
 0xfe3   :  { %v2407_v33 = vmax.f32 %v2397_v10, 0.0 }
 0xfe5   :  { %2417 = vrot.lane.b32.xlu1 %v2407_v33, %s3326_s13 }
 0xfe9   :  { %2419 = vrot.lane.b32.xlu1 %v2408_v51, %s3326_s13 }
0x1051   :  { %v2416_v5 = vpop.permute.xlu1 %2415 }
0x1052   :  { %v2426_v22 = vmul.f32 %v2416_v5, %v2392_v46 }
0x1053   :  { %v2414_v26 = vpop.permute.xlu0 %2413 }
0x1054   :  { %v2425_v30 = vmul.f32 %v2414_v26, %v2387_v3 }
0x1056   :  { %3131 = vmatprep.mubr.msk.f32.mxu0 %vm1166_vm1, %v2425_v30 }
0x1057   :  { %v2418_v15 = vpop.permute.xlu1 %2417  ;;  %3132 = vmatmul.mubr.msk.f32.vlgmr.msra.gmra.mxu0 %vm1166_vm1, %v2426_v22 }
0x1058   :  { %v2427_v19 = vmul.f32 %v2418_v15, %v2397_v10 }
0x105a   :  { %3134 = vmatprep.mubr.msk.f32.mxu0 %vm1166_vm1, %v2427_v19 }
0x105b   :  { %v2420_v56 = vpop.permute.xlu1 %2419 }
0x105c   :  { %v2428_v12 = vmul.f32 %v2420_v56, %v2402_v47 }
0x105e   :  { %3135 = vmatmul.mubr.msk.f32.gmra.mxu0 %vm1166_vm1, %v2428_v12 }
0x1117   :  { %v3133_v59 = vpop.f32.mrf.mxu0 }
0x1119   :  { %v2515_v13 = vpop.f32.mrf.mxu0 }
0x111a   :  { %v2532_v14 = vadd.f32 %v2515_v13, %v4154_v55 }
0x111c   :  { %v2539_v32 = vadd.f32 %v2724_v23, %v2532_v14 }
0x111e   :  { %v3136_v27 = vpop.f32.mrf.mxu0 }
0x1120   :  { %v2524_v62 = vpop.f32.mrf.mxu0 }
0x1121   :  { %v2533_v11 = vadd.f32 %v2524_v62, %v4161_v48 }
0x1123   :  { %v2540_v21 = vadd.f32 %v2724_v23, %v2533_v11 }
0x1125   :  { %v2542_v9 = vrot.slane %v2540_v21, 7 }
0x1127   :  { %v2545_v7 = vsel %vm2544_vm2, %v2539_v32, %v2542_v9 }
0x1128   :  { %v2549_v18 = vsel %vm2548_vm3, %v2545_v7, 0.0 }
0x1129   :  { %2550 = vadd.xlane.f32.xlu0 %v2549_v18 }
0x11b2   :  { %v2551_v20 = vpop.xlane.xlu0 %2550 }
0x11b3   :  { %v2552_v39 = vmul.f32 0.03125, %v2551_v20 }
0x11b5   :  { %v2553_v6 = vsub.f32 %v2545_v7, %v2552_v39 }
0x11b7   :  { %v2554_v42 = vmul.f32 %v2553_v6, %v2553_v6 }
0x11b9   :  { %v2555_v49 = vsel %vm2548_vm3, %v2554_v42, 0.0 }
0x11ba   :  { %2556 = vadd.xlane.f32.xlu1 %v2555_v49 }
0x1243   :  { %v2557_v55 = vpop.xlane.xlu1 %2556 }
0x1244   :  { %v2558_v44 = vmul.f32 0.03125, %v2557_v55 }
0x1246   :  { %v2559_v48 = vadd.f32 1e-05, %v2558_v44 }
0x1248   :  { %3294 = vrsqrt.f32 %v2559_v48 }
0x1255   :  { %v3295_v34 = vpop.eup %3294 }
0x1256   :  { %v2561_v8 = vmul.f32 %v3295_v34, %v2553_v6 }
0x1258   :  { %v2566_v25 = vmul.f32 %v2725_v45, %v2561_v8 }
0x125a   :  { %v2571_v31 = vadd.f32 %v2726_v50, %v2566_v25 }
0x125c   :  { %v2572_v53 = vmax.f32 %v2571_v31, 0.0 }
0x125e   :  { %v2578_v36 = vmul.f32 %v2727_v17, %v2572_v53 }
0x1260   :  { %v2579_v41 = vsel %vm2548_vm3, %v2578_v36, 0.0 }
0x1261   :  { %2580 = vadd.xlane.f32.xlu0 %v2579_v41 }
0x12ea   :  { %v2581_v58 = vpop.xlane.xlu0 %2580 }
0x12eb   :  { %v2587_v54 = vadd.f32 %v2728_v61, %v2581_v58 }
0x12ed   :  { %2589 = vst.msk [vmem:[%s4233_s5] sm:$0x3] %vm2588_vm4, %v2587_v54 }
0x12ee   :  { %2594 = vsyncpa [#allocation3], 1 }

</bundles_post_ra>
